<compile_context>
chip_gen: v5e
topology: v5e:2x2
jax: 0.10.0
libtpu: 0.0.40
codegen_flags: <defaults>
</compile_context>

<pallas_src>
import jax
import jax.numpy as jnp
from jax.experimental import pallas as pl
from jax.experimental.pallas import tpu as pltpu

EPS = 1e-5


def _round_up(a, b):
    return (a + b - 1) // b * b


def _vmem_limit_bytes(tile_n, in_p, hid_p, out_p):
    bf16, f32 = 2, 4
    io = 2 * tile_n * in_p * bf16 + 2 * tile_n * out_p * f32       # double-buffered x / out
    weights = 2 * (in_p * hid_p + hid_p * out_p) * bf16            # resident operands (2x budget)
    vectors = 2 * 4 * (hid_p + out_p) * f32                        # gamma/beta + BN scratch
    live = 3 * tile_n * max(hid_p, out_p) * f32                    # h / a / y temporaries
    est = io + weights + vectors + live
    # 2x margin, clamped to [16 MiB, 48 MiB] (v7x only has 64 MiB physical VMEM).
    return int(min(max(2 * est, 16 * 2**20), 48 * 2**20))


def _make_kernel(tile_n, n_valid, eps):
    inv_n = 1.0 / float(n_valid)

    def kernel(x_ref, w1_ref, g1_ref, be1_ref, w2_ref, g2_ref, be2_ref,
               o_ref,
               sum1, sq1, sc1, sh1, sum2, sq2, sc2, sh2):
        p = pl.program_id(0)            # pass: 0 = BN1 stats, 1 = BN2 stats, 2 = write out
        i = pl.program_id(1)            # batch tile
        last = pl.num_programs(1) - 1

        # Validity mask for batch-padding rows (kept out of the BN statistics).
        rows = jax.lax.broadcasted_iota(jnp.int32, (tile_n, 1), 0) + i * tile_n
        mask = (rows < n_valid).astype(jnp.float32)

        # ---- Linear 1 (bf16 MXU, f32 accumulate). Bias dropped: cancelled by BN mean. ----
        h = jnp.dot(x_ref[...], w1_ref[...], preferred_element_type=jnp.float32)

        @pl.when(p == 0)
        def _bn1_stats():
            @pl.when(i == 0)
            def _():
                sum1[...] = jnp.zeros_like(sum1)
                sq1[...] = jnp.zeros_like(sq1)

            hm = h * mask
            sum1[...] += jnp.sum(hm, axis=0, keepdims=True)
            sq1[...] += jnp.sum(hm * hm, axis=0, keepdims=True)

            @pl.when(i == last)
            def _():
                mu = sum1[...] * inv_n
                var = jnp.maximum(sq1[...] * inv_n - mu * mu, 0.0)
                s = g1_ref[...] * jax.lax.rsqrt(var + eps)
                sc1[...] = s
                sh1[...] = be1_ref[...] - mu * s

        @pl.when(p > 0)
        def _layer2():
            # BN1 (folded scale/shift) + ReLU in f32, then Linear 2 in bf16.
            a = jnp.maximum(h * sc1[...] + sh1[...], 0.0)
            y = jnp.dot(a.astype(jnp.bfloat16), w2_ref[...],
                        preferred_element_type=jnp.float32)

            @pl.when(p == 1)
            def _bn2_stats():
                @pl.when(i == 0)
                def _():
                    sum2[...] = jnp.zeros_like(sum2)
                    sq2[...] = jnp.zeros_like(sq2)

                ym = y * mask
                sum2[...] += jnp.sum(ym, axis=0, keepdims=True)
                sq2[...] += jnp.sum(ym * ym, axis=0, keepdims=True)

                @pl.when(i == last)
                def _():
                    mu = sum2[...] * inv_n
                    var = jnp.maximum(sq2[...] * inv_n - mu * mu, 0.0)
                    s = g2_ref[...] * jax.lax.rsqrt(var + eps)
                    sc2[...] = s
                    sh2[...] = be2_ref[...] - mu * s

            @pl.when(p == 2)
            def _write():
                o_ref[...] = jnp.maximum(y * sc2[...] + sh2[...], 0.0)

        # Output block is only meaningful on the final pass; keep the buffer
        # defined on earlier passes (it is overwritten on pass 2).
        @pl.when(p != 2)
        def _():
            o_ref[...] = jnp.zeros_like(o_ref)

    return kernel


def simple_mlp(x, params, *, tile_n=512):
    """x: [N, input_dim] float32. params: dict of weights (see init_params)."""
    n, in_dim = x.shape
    hid = params["w1"].shape[1]
    out_dim = params["w2"].shape[1]

    # Lane-align feature dims to 128; batch tile is a multiple of 8.
    in_p = _round_up(in_dim, 128)
    hid_p = _round_up(hid, 128)
    out_p = _round_up(out_dim, 128)
    tile_n = max(8, min(_round_up(tile_n, 8), _round_up(n, 8)))
    n_p = _round_up(n, tile_n)
    num_tiles = n_p // tile_n

    f32, bf16 = jnp.float32, jnp.bfloat16

    # Zero-pad to aligned shapes; bf16 for the MXU operands.
    xp = jnp.zeros((n_p, in_p), bf16).at[:n, :in_dim].set(x.astype(bf16))
    w1 = jnp.zeros((in_p, hid_p), bf16).at[:in_dim, :hid].set(params["w1"].astype(bf16))
    w2 = jnp.zeros((hid_p, out_p), bf16).at[:hid, :out_dim].set(params["w2"].astype(bf16))
    g1 = jnp.ones((1, hid_p), f32).at[:, :hid].set(params["gamma1"].reshape(1, -1).astype(f32))
    be1 = jnp.zeros((1, hid_p), f32).at[:, :hid].set(params["beta1"].reshape(1, -1).astype(f32))
    g2 = jnp.ones((1, out_p), f32).at[:, :out_dim].set(params["gamma2"].reshape(1, -1).astype(f32))
    be2 = jnp.zeros((1, out_p), f32).at[:, :out_dim].set(params["beta2"].reshape(1, -1).astype(f32))
    # NOTE: params["b1"] / params["b2"] are intentionally NOT passed to the kernel:
    # a constant per-feature bias before training-mode BatchNorm is exactly
    # cancelled by the mean subtraction, so the bias adds are dead work.

    kernel = _make_kernel(tile_n, n, EPS)

    resident = lambda p, i: (0, 0)   # weights / gamma / beta: same block every step
    tiled = lambda p, i: (i, 0)      # x / out: tiled over the batch axis

    out = pl.pallas_call(
        kernel,
        out_shape=jax.ShapeDtypeStruct((n_p, out_p), f32),
        grid_spec=pltpu.PrefetchScalarGridSpec(
            num_scalar_prefetch=0,
            grid=(3, num_tiles),                 # (pass, batch tile); last axis fastest
            in_specs=[
                pl.BlockSpec((tile_n, in_p), tiled),      # x
                pl.BlockSpec((in_p, hid_p), resident),    # w1
                pl.BlockSpec((1, hid_p), resident),       # gamma1
                pl.BlockSpec((1, hid_p), resident),       # beta1
                pl.BlockSpec((hid_p, out_p), resident),   # w2
                pl.BlockSpec((1, out_p), resident),       # gamma2
                pl.BlockSpec((1, out_p), resident),       # beta2
            ],
            out_specs=pl.BlockSpec((tile_n, out_p), tiled),
            scratch_shapes=[
                pltpu.VMEM((1, hid_p), f32),   # sum1
                pltpu.VMEM((1, hid_p), f32),   # sumsq1
                pltpu.VMEM((1, hid_p), f32),   # scale1
                pltpu.VMEM((1, hid_p), f32),   # shift1
                pltpu.VMEM((1, out_p), f32),   # sum2
                pltpu.VMEM((1, out_p), f32),   # sumsq2
                pltpu.VMEM((1, out_p), f32),   # scale2
                pltpu.VMEM((1, out_p), f32),   # shift2
            ],
        ),
        compiler_params=pltpu.CompilerParams(
            # Both axes carry scratch dependencies (stats accumulate across
            # tiles; scale/shift carry across passes) -> "arbitrary".
            dimension_semantics=("arbitrary", "arbitrary"),
            vmem_limit_bytes=_vmem_limit_bytes(tile_n, in_p, hid_p, out_p),
        ),
    )(xp, w1, g1, be1, w2, g2, be2)

    return out[:n, :out_dim]


def init_params(key, input_dim, hidden_dim, output_dim):
    """Deterministic synthetic parameters (shapes match SimpleMLP.__init__)."""
    k1, k2, k3, k4 = jax.random.split(key, 4)
    scale1 = 1.0 / jnp.sqrt(input_dim)
    scale2 = 1.0 / jnp.sqrt(hidden_dim)
    return {
        # Linear weights stored as [in, out] (transpose of PyTorch's [out, in]).
        "w1": jax.random.uniform(k1, (input_dim, hidden_dim), jnp.float32, -scale1, scale1),
        "b1": jax.random.uniform(k2, (1, hidden_dim), jnp.float32, -scale1, scale1),
        "gamma1": jnp.ones((1, hidden_dim), jnp.float32),
        "beta1": jnp.zeros((1, hidden_dim), jnp.float32),
        "w2": jax.random.uniform(k3, (hidden_dim, output_dim), jnp.float32, -scale2, scale2),
        "b2": jax.random.uniform(k4, (1, output_dim), jnp.float32, -scale2, scale2),
        "gamma2": jnp.ones((1, output_dim), jnp.float32),
        "beta2": jnp.zeros((1, output_dim), jnp.float32),
    }


def simple_mlp_ref(x, p):
    """Pure-JAX f32 reference matching the PyTorch module (training-mode BN)."""
    h = x @ p["w1"] + p["b1"]
    mu = h.mean(0, keepdims=True)
    var = ((h - mu) ** 2).mean(0, keepdims=True)
    h = (h - mu) / jnp.sqrt(var + EPS) * p["gamma1"] + p["beta1"]
    h = jnp.maximum(h, 0.0)
    y = h @ p["w2"] + p["b2"]
    mu = y.mean(0, keepdims=True)
    var = ((y - mu) ** 2).mean(0, keepdims=True)
    y = (y - mu) / jnp.sqrt(var + EPS) * p["gamma2"] + p["beta2"]
    return jnp.maximum(y, 0.0)


if __name__ == "__main__":
    # batch=250 (not a tile multiple) exercises the padded-row masking;
    # tile_n=128 gives 2 batch tiles -> exercises cross-tile BN accumulation.
    batch, input_dim, hidden_dim, output_dim = 250, 16, 32, 8

    key = jax.random.PRNGKey(0)
    kx, kp = jax.random.split(key)
    x = jax.random.normal(kx, (batch, input_dim), jnp.float32)
    params = init_params(kp, input_dim, hidden_dim, output_dim)

    out = simple_mlp(x, params, tile_n=128)
    out = jax.block_until_ready(out)

    ref = simple_mlp_ref(x, params)
    assert out.shape == (batch, output_dim)
    # bf16 matmul inputs => loosened tolerance vs the f32 reference.
    assert jnp.allclose(out, ref, atol=5e-2, rtol=5e-2), "mismatch vs reference"

    print("KERNEL_OK")
</pallas_src>

<mosaic_0001>
module attributes {stable_mosaic.version = 11 : i64} {
  func.func @kernel(%arg0: i32, %arg1: i32, %arg2: memref<128x128xbf16, #tpu.memory_space<vmem>>, %arg3: memref<128x128xbf16, #tpu.memory_space<vmem>>, %arg4: memref<1x128xf32, #tpu.memory_space<vmem>>, %arg5: memref<1x128xf32, #tpu.memory_space<vmem>>, %arg6: memref<128x128xbf16, #tpu.memory_space<vmem>>, %arg7: memref<1x128xf32, #tpu.memory_space<vmem>>, %arg8: memref<1x128xf32, #tpu.memory_space<vmem>>, %arg9: memref<128x128xf32, #tpu.memory_space<vmem>>, %arg10: memref<1x128xf32, #tpu.memory_space<vmem>>, %arg11: memref<1x128xf32, #tpu.memory_space<vmem>>, %arg12: memref<1x128xf32, #tpu.memory_space<vmem>>, %arg13: memref<1x128xf32, #tpu.memory_space<vmem>>, %arg14: memref<1x128xf32, #tpu.memory_space<vmem>>, %arg15: memref<1x128xf32, #tpu.memory_space<vmem>>, %arg16: memref<1x128xf32, #tpu.memory_space<vmem>>, %arg17: memref<1x128xf32, #tpu.memory_space<vmem>>) attributes {dimension_semantics = [#tpu.dimension_semantics<arbitrary>, #tpu.dimension_semantics<arbitrary>], iteration_bounds = array<i64: 3, 2>, scalar_prefetch = 0 : i64, scratch_operands = 8 : i64, tpu.core_type = #tpu.core_type<tc>, window_params = [{transform_indices = @transform_0, window_bounds = array<i64: 128, 128>}, {pipeline_mode = #tpu.pipeline_mode<synchronous>, transform_indices = @transform_1, window_bounds = array<i64: 128, 128>}, {pipeline_mode = #tpu.pipeline_mode<synchronous>, transform_indices = @transform_2, window_bounds = array<i64: 1, 128>}, {pipeline_mode = #tpu.pipeline_mode<synchronous>, transform_indices = @transform_3, window_bounds = array<i64: 1, 128>}, {pipeline_mode = #tpu.pipeline_mode<synchronous>, transform_indices = @transform_4, window_bounds = array<i64: 128, 128>}, {pipeline_mode = #tpu.pipeline_mode<synchronous>, transform_indices = @transform_5, window_bounds = array<i64: 1, 128>}, {pipeline_mode = #tpu.pipeline_mode<synchronous>, transform_indices = @transform_6, window_bounds = array<i64: 1, 128>}, {transform_indices = @transform_7, window_bounds = array<i64: 128, 128>}]} {
    %0 = tpu.iota {dimensions = array<i32: 0>} : vector<128x1xi32>
    %c128_i32 = arith.constant 128 : i32
    %1 = arith.muli %arg1, %c128_i32 : i32
    %2 = vector.broadcast %1 : i32 to vector<128x1xi32>
    %3 = arith.addi %0, %2 : vector<128x1xi32>
    %c250_i32 = arith.constant 250 : i32
    %4 = vector.broadcast %c250_i32 : i32 to vector<128x1xi32>
    %5 = arith.cmpi slt, %3, %4 : vector<128x1xi32>
    %6 = arith.extui %5 : vector<128x1xi1> to vector<128x1xi32>
    %7 = arith.sitofp %6 : vector<128x1xi32> to vector<128x1xf32>
    %c0 = arith.constant 0 : index
    %c0_0 = arith.constant 0 : index
    %8 = vector.load %arg2[%c0, %c0_0] : memref<128x128xbf16, #tpu.memory_space<vmem>>, vector<128x128xbf16>
    %c0_1 = arith.constant 0 : index
    %c0_2 = arith.constant 0 : index
    %9 = vector.load %arg3[%c0_1, %c0_2] : memref<128x128xbf16, #tpu.memory_space<vmem>>, vector<128x128xbf16>
    %cst = arith.constant dense<0.000000e+00> : vector<128x128xf32>
    %10 = tpu.matmul %8, %9, %cst {dimension_numbers = #tpu.dot_dimension_numbers<[1], [0], [0], [1], [0, 0, 1, 1], [], []>} : vector<128x128xbf16>, vector<128x128xbf16>, vector<128x128xf32> -> vector<128x128xf32>
    %c0_i32 = arith.constant 0 : i32
    %11 = arith.cmpi eq, %arg0, %c0_i32 : i32
    %12 = arith.extui %11 : i1 to i32
    %c0_i32_3 = arith.constant 0 : i32
    %13 = arith.cmpi ne, %12, %c0_i32_3 : i32
    scf.if %13 {
      %c0_i32_7 = arith.constant 0 : i32
      %20 = arith.cmpi eq, %arg1, %c0_i32_7 : i32
      %21 = arith.extui %20 : i1 to i32
      %c0_i32_8 = arith.constant 0 : i32
      %22 = arith.cmpi ne, %21, %c0_i32_8 : i32
      scf.if %22 {
        %cst_20 = arith.constant 0.000000e+00 : f32
        %39 = vector.broadcast %cst_20 : f32 to vector<1x128xf32>
        %c0_21 = arith.constant 0 : index
        %c0_22 = arith.constant 0 : index
        %40 = vector.load %arg10[%c0_21, %c0_22] : memref<1x128xf32, #tpu.memory_space<vmem>>, vector<1x128xf32>
        tpu.vector_store %arg10[%c0_21, %c0_22], %39 {strides = array<i32>} : memref<1x128xf32, #tpu.memory_space<vmem>>, vector<1x128xf32>,
        %cst_23 = arith.constant 0.000000e+00 : f32
        %41 = vector.broadcast %cst_23 : f32 to vector<1x128xf32>
        %c0_24 = arith.constant 0 : index
        %c0_25 = arith.constant 0 : index
        %42 = vector.load %arg11[%c0_24, %c0_25] : memref<1x128xf32, #tpu.memory_space<vmem>>, vector<1x128xf32>
        tpu.vector_store %arg11[%c0_24, %c0_25], %41 {strides = array<i32>} : memref<1x128xf32, #tpu.memory_space<vmem>>, vector<1x128xf32>,
      } else {
      }
      %23 = vector.broadcast %7 : vector<128x1xf32> to vector<128x128xf32>
      %24 = arith.mulf %10, %23 : vector<128x128xf32>
      %c0_9 = arith.constant 0 : index
      %c0_10 = arith.constant 0 : index
      %25 = vector.load %arg10[%c0_9, %c0_10] : memref<1x128xf32, #tpu.memory_space<vmem>>, vector<1x128xf32>
      %cst_11 = arith.constant dense<0.000000e+00> : vector<128xf32>
      %26 = vector.multi_reduction <add>, %24, %cst_11 [0] : vector<128x128xf32> to vector<128xf32>
      %27 = vector.shape_cast %26 : vector<128xf32> to vector<1x128xf32>
      %28 = arith.addf %25, %27 : vector<1x128xf32>
      %c0_12 = arith.constant 0 : index
      %c0_13 = arith.constant 0 : index
      %29 = vector.load %arg10[%c0_12, %c0_13] : memref<1x128xf32, #tpu.memory_space<vmem>>, vector<1x128xf32>
      tpu.vector_store %arg10[%c0_12, %c0_13], %28 {strides = array<i32>} : memref<1x128xf32, #tpu.memory_space<vmem>>, vector<1x128xf32>,
      %c0_14 = arith.constant 0 : index
      %c0_15 = arith.constant 0 : index
      %30 = vector.load %arg11[%c0_14, %c0_15] : memref<1x128xf32, #tpu.memory_space<vmem>>, vector<1x128xf32>
      %31 = arith.mulf %24, %24 : vector<128x128xf32>
      %cst_16 = arith.constant dense<0.000000e+00> : vector<128xf32>
      %32 = vector.multi_reduction <add>, %31, %cst_16 [0] : vector<128x128xf32> to vector<128xf32>
      %33 = vector.shape_cast %32 : vector<128xf32> to vector<1x128xf32>
      %34 = arith.addf %30, %33 : vector<1x128xf32>
      %c0_17 = arith.constant 0 : index
      %c0_18 = arith.constant 0 : index
      %35 = vector.load %arg11[%c0_17, %c0_18] : memref<1x128xf32, #tpu.memory_space<vmem>>, vector<1x128xf32>
      tpu.vector_store %arg11[%c0_17, %c0_18], %34 {strides = array<i32>} : memref<1x128xf32, #tpu.memory_space<vmem>>, vector<1x128xf32>,
      %c1_i32 = arith.constant 1 : i32
      %36 = arith.cmpi eq, %arg1, %c1_i32 : i32
      %37 = arith.extui %36 : i1 to i32
      %c0_i32_19 = arith.constant 0 : i32
      %38 = arith.cmpi ne, %37, %c0_i32_19 : i32
      scf.if %38 {
        %c0_20 = arith.constant 0 : index
        %c0_21 = arith.constant 0 : index
        %39 = vector.load %arg10[%c0_20, %c0_21] : memref<1x128xf32, #tpu.memory_space<vmem>>, vector<1x128xf32>
        %cst_22 = arith.constant 4.000000e-03 : f32
        %40 = vector.broadcast %cst_22 : f32 to vector<1x128xf32>
        %41 = arith.mulf %39, %40 : vector<1x128xf32>
        %c0_23 = arith.constant 0 : index
        %c0_24 = arith.constant 0 : index
        %42 = vector.load %arg11[%c0_23, %c0_24] : memref<1x128xf32, #tpu.memory_space<vmem>>, vector<1x128xf32>
        %cst_25 = arith.constant 4.000000e-03 : f32
        %43 = vector.broadcast %cst_25 : f32 to vector<1x128xf32>
        %44 = arith.mulf %42, %43 : vector<1x128xf32>
        %45 = arith.mulf %41, %41 : vector<1x128xf32>
        %46 = arith.subf %44, %45 : vector<1x128xf32>
        %cst_26 = arith.constant 0.000000e+00 : f32
        %47 = vector.broadcast %cst_26 : f32 to vector<1x128xf32>
        %48 = arith.maximumf %46, %47 : vector<1x128xf32>
        %c0_27 = arith.constant 0 : index
        %c0_28 = arith.constant 0 : index
        %49 = vector.load %arg4[%c0_27, %c0_28] : memref<1x128xf32, #tpu.memory_space<vmem>>, vector<1x128xf32>
        %cst_29 = arith.constant 9.99999974E-6 : f32
        %50 = vector.broadcast %cst_29 : f32 to vector<1x128xf32>
        %51 = arith.addf %48, %50 : vector<1x128xf32>
        %52 = math.rsqrt %51 : vector<1x128xf32>
        %53 = arith.mulf %49, %52 : vector<1x128xf32>
        %c0_30 = arith.constant 0 : index
        %c0_31 = arith.constant 0 : index
        %54 = vector.load %arg12[%c0_30, %c0_31] : memref<1x128xf32, #tpu.memory_space<vmem>>, vector<1x128xf32>
        tpu.vector_store %arg12[%c0_30, %c0_31], %53 {strides = array<i32>} : memref<1x128xf32, #tpu.memory_space<vmem>>, vector<1x128xf32>,
        %c0_32 = arith.constant 0 : index
        %c0_33 = arith.constant 0 : index
        %55 = vector.load %arg5[%c0_32, %c0_33] : memref<1x128xf32, #tpu.memory_space<vmem>>, vector<1x128xf32>
        %56 = arith.mulf %41, %53 : vector<1x128xf32>
        %57 = arith.subf %55, %56 : vector<1x128xf32>
        %c0_34 = arith.constant 0 : index
        %c0_35 = arith.constant 0 : index
        %58 = vector.load %arg13[%c0_34, %c0_35] : memref<1x128xf32, #tpu.memory_space<vmem>>, vector<1x128xf32>
        tpu.vector_store %arg13[%c0_34, %c0_35], %57 {strides = array<i32>} : memref<1x128xf32, #tpu.memory_space<vmem>>, vector<1x128xf32>,
      } else {
      }
    } else {
    }
    %c0_i32_4 = arith.constant 0 : i32
    %14 = arith.cmpi sgt, %arg0, %c0_i32_4 : i32
    %15 = arith.extui %14 : i1 to i32
    %c0_i32_5 = arith.constant 0 : i32
    %16 = arith.cmpi ne, %15, %c0_i32_5 : i32
    scf.if %16 {
      %c0_7 = arith.constant 0 : index
      %c0_8 = arith.constant 0 : index
      %20 = vector.load %arg12[%c0_7, %c0_8] : memref<1x128xf32, #tpu.memory_space<vmem>>, vector<1x128xf32>
      %21 = vector.broadcast %20 : vector<1x128xf32> to vector<128x128xf32>
      %22 = arith.mulf %10, %21 : vector<128x128xf32>
      %c0_9 = arith.constant 0 : index
      %c0_10 = arith.constant 0 : index
      %23 = vector.load %arg13[%c0_9, %c0_10] : memref<1x128xf32, #tpu.memory_space<vmem>>, vector<1x128xf32>
      %24 = vector.broadcast %23 : vector<1x128xf32> to vector<128x128xf32>
      %25 = arith.addf %22, %24 : vector<128x128xf32>
      %cst_11 = arith.constant 0.000000e+00 : f32
      %26 = vector.broadcast %cst_11 : f32 to vector<128x128xf32>
      %27 = arith.maximumf %25, %26 : vector<128x128xf32>
      %28 = arith.truncf %27 : vector<128x128xf32> to vector<128x128xbf16>
      %c0_12 = arith.constant 0 : index
      %c0_13 = arith.constant 0 : index
      %29 = vector.load %arg6[%c0_12, %c0_13] : memref<128x128xbf16, #tpu.memory_space<vmem>>, vector<128x128xbf16>
      %cst_14 = arith.constant dense<0.000000e+00> : vector<128x128xf32>
      %30 = tpu.matmul %28, %29, %cst_14 {dimension_numbers = #tpu.dot_dimension_numbers<[1], [0], [0], [1], [0, 0, 1, 1], [], []>} : vector<128x128xbf16>, vector<128x128xbf16>, vector<128x128xf32> -> vector<128x128xf32>
      %c1_i32 = arith.constant 1 : i32
      %31 = arith.cmpi eq, %arg0, %c1_i32 : i32
      %32 = arith.extui %31 : i1 to i32
      %c0_i32_15 = arith.constant 0 : i32
      %33 = arith.cmpi ne, %32, %c0_i32_15 : i32
      scf.if %33 {
        %c0_i32_18 = arith.constant 0 : i32
        %37 = arith.cmpi eq, %arg1, %c0_i32_18 : i32
        %38 = arith.extui %37 : i1 to i32
        %c0_i32_19 = arith.constant 0 : i32
        %39 = arith.cmpi ne, %38, %c0_i32_19 : i32
        scf.if %39 {
          %cst_32 = arith.constant 0.000000e+00 : f32
          %56 = vector.broadcast %cst_32 : f32 to vector<1x128xf32>
          %c0_33 = arith.constant 0 : index
          %c0_34 = arith.constant 0 : index
          %57 = vector.load %arg14[%c0_33, %c0_34] : memref<1x128xf32, #tpu.memory_space<vmem>>, vector<1x128xf32>
          tpu.vector_store %arg14[%c0_33, %c0_34], %56 {strides = array<i32>} : memref<1x128xf32, #tpu.memory_space<vmem>>, vector<1x128xf32>,
          %cst_35 = arith.constant 0.000000e+00 : f32
          %58 = vector.broadcast %cst_35 : f32 to vector<1x128xf32>
          %c0_36 = arith.constant 0 : index
          %c0_37 = arith.constant 0 : index
          %59 = vector.load %arg15[%c0_36, %c0_37] : memref<1x128xf32, #tpu.memory_space<vmem>>, vector<1x128xf32>
          tpu.vector_store %arg15[%c0_36, %c0_37], %58 {strides = array<i32>} : memref<1x128xf32, #tpu.memory_space<vmem>>, vector<1x128xf32>,
        } else {
        }
        %40 = vector.broadcast %7 : vector<128x1xf32> to vector<128x128xf32>
        %41 = arith.mulf %30, %40 : vector<128x128xf32>
        %c0_20 = arith.constant 0 : index
        %c0_21 = arith.constant 0 : index
        %42 = vector.load %arg14[%c0_20, %c0_21] : memref<1x128xf32, #tpu.memory_space<vmem>>, vector<1x128xf32>
        %cst_22 = arith.constant dense<0.000000e+00> : vector<128xf32>
        %43 = vector.multi_reduction <add>, %41, %cst_22 [0] : vector<128x128xf32> to vector<128xf32>
        %44 = vector.shape_cast %43 : vector<128xf32> to vector<1x128xf32>
        %45 = arith.addf %42, %44 : vector<1x128xf32>
        %c0_23 = arith.constant 0 : index
        %c0_24 = arith.constant 0 : index
        %46 = vector.load %arg14[%c0_23, %c0_24] : memref<1x128xf32, #tpu.memory_space<vmem>>, vector<1x128xf32>
        tpu.vector_store %arg14[%c0_23, %c0_24], %45 {strides = array<i32>} : memref<1x128xf32, #tpu.memory_space<vmem>>, vector<1x128xf32>,
        %c0_25 = arith.constant 0 : index
        %c0_26 = arith.constant 0 : index
        %47 = vector.load %arg15[%c0_25, %c0_26] : memref<1x128xf32, #tpu.memory_space<vmem>>, vector<1x128xf32>
        %48 = arith.mulf %41, %41 : vector<128x128xf32>
        %cst_27 = arith.constant dense<0.000000e+00> : vector<128xf32>
        %49 = vector.multi_reduction <add>, %48, %cst_27 [0] : vector<128x128xf32> to vector<128xf32>
        %50 = vector.shape_cast %49 : vector<128xf32> to vector<1x128xf32>
        %51 = arith.addf %47, %50 : vector<1x128xf32>
        %c0_28 = arith.constant 0 : index
        %c0_29 = arith.constant 0 : index
        %52 = vector.load %arg15[%c0_28, %c0_29] : memref<1x128xf32, #tpu.memory_space<vmem>>, vector<1x128xf32>
        tpu.vector_store %arg15[%c0_28, %c0_29], %51 {strides = array<i32>} : memref<1x128xf32, #tpu.memory_space<vmem>>, vector<1x128xf32>,
        %c1_i32_30 = arith.constant 1 : i32
        %53 = arith.cmpi eq, %arg1, %c1_i32_30 : i32
        %54 = arith.extui %53 : i1 to i32
        %c0_i32_31 = arith.constant 0 : i32
        %55 = arith.cmpi ne, %54, %c0_i32_31 : i32
        scf.if %55 {
          %c0_32 = arith.constant 0 : index
          %c0_33 = arith.constant 0 : index
          %56 = vector.load %arg14[%c0_32, %c0_33] : memref<1x128xf32, #tpu.memory_space<vmem>>, vector<1x128xf32>
          %cst_34 = arith.constant 4.000000e-03 : f32
          %57 = vector.broadcast %cst_34 : f32 to vector<1x128xf32>
          %58 = arith.mulf %56, %57 : vector<1x128xf32>
          %c0_35 = arith.constant 0 : index
          %c0_36 = arith.constant 0 : index
          %59 = vector.load %arg15[%c0_35, %c0_36] : memref<1x128xf32, #tpu.memory_space<vmem>>, vector<1x128xf32>
          %cst_37 = arith.constant 4.000000e-03 : f32
          %60 = vector.broadcast %cst_37 : f32 to vector<1x128xf32>
          %61 = arith.mulf %59, %60 : vector<1x128xf32>
          %62 = arith.mulf %58, %58 : vector<1x128xf32>
          %63 = arith.subf %61, %62 : vector<1x128xf32>
          %cst_38 = arith.constant 0.000000e+00 : f32
          %64 = vector.broadcast %cst_38 : f32 to vector<1x128xf32>
          %65 = arith.maximumf %63, %64 : vector<1x128xf32>
          %c0_39 = arith.constant 0 : index
          %c0_40 = arith.constant 0 : index
          %66 = vector.load %arg7[%c0_39, %c0_40] : memref<1x128xf32, #tpu.memory_space<vmem>>, vector<1x128xf32>
          %cst_41 = arith.constant 9.99999974E-6 : f32
          %67 = vector.broadcast %cst_41 : f32 to vector<1x128xf32>
          %68 = arith.addf %65, %67 : vector<1x128xf32>
          %69 = math.rsqrt %68 : vector<1x128xf32>
          %70 = arith.mulf %66, %69 : vector<1x128xf32>
          %c0_42 = arith.constant 0 : index
          %c0_43 = arith.constant 0 : index
          %71 = vector.load %arg16[%c0_42, %c0_43] : memref<1x128xf32, #tpu.memory_space<vmem>>, vector<1x128xf32>
          tpu.vector_store %arg16[%c0_42, %c0_43], %70 {strides = array<i32>} : memref<1x128xf32, #tpu.memory_space<vmem>>, vector<1x128xf32>,
          %c0_44 = arith.constant 0 : index
          %c0_45 = arith.constant 0 : index
          %72 = vector.load %arg8[%c0_44, %c0_45] : memref<1x128xf32, #tpu.memory_space<vmem>>, vector<1x128xf32>
          %73 = arith.mulf %58, %70 : vector<1x128xf32>
          %74 = arith.subf %72, %73 : vector<1x128xf32>
          %c0_46 = arith.constant 0 : index
          %c0_47 = arith.constant 0 : index
          %75 = vector.load %arg17[%c0_46, %c0_47] : memref<1x128xf32, #tpu.memory_space<vmem>>, vector<1x128xf32>
          tpu.vector_store %arg17[%c0_46, %c0_47], %74 {strides = array<i32>} : memref<1x128xf32, #tpu.memory_space<vmem>>, vector<1x128xf32>,
        } else {
        }
      } else {
      }
      %c2_i32_16 = arith.constant 2 : i32
      %34 = arith.cmpi eq, %arg0, %c2_i32_16 : i32
      %35 = arith.extui %34 : i1 to i32
      %c0_i32_17 = arith.constant 0 : i32
      %36 = arith.cmpi ne, %35, %c0_i32_17 : i32
      scf.if %36 {
        %c0_18 = arith.constant 0 : index
        %c0_19 = arith.constant 0 : index
        %37 = vector.load %arg16[%c0_18, %c0_19] : memref<1x128xf32, #tpu.memory_space<vmem>>, vector<1x128xf32>
        %38 = vector.broadcast %37 : vector<1x128xf32> to vector<128x128xf32>
        %39 = arith.mulf %30, %38 : vector<128x128xf32>
        %c0_20 = arith.constant 0 : index
        %c0_21 = arith.constant 0 : index
        %40 = vector.load %arg17[%c0_20, %c0_21] : memref<1x128xf32, #tpu.memory_space<vmem>>, vector<1x128xf32>
        %41 = vector.broadcast %40 : vector<1x128xf32> to vector<128x128xf32>
        %42 = arith.addf %39, %41 : vector<128x128xf32>
        %cst_22 = arith.constant 0.000000e+00 : f32
        %43 = vector.broadcast %cst_22 : f32 to vector<128x128xf32>
        %44 = arith.maximumf %42, %43 : vector<128x128xf32>
        %c0_23 = arith.constant 0 : index
        %c0_24 = arith.constant 0 : index
        %45 = vector.load %arg9[%c0_23, %c0_24] : memref<128x128xf32, #tpu.memory_space<vmem>>, vector<128x128xf32>
        tpu.vector_store %arg9[%c0_23, %c0_24], %44 {strides = array<i32>} : memref<128x128xf32, #tpu.memory_space<vmem>>, vector<128x128xf32>,
      } else {
      }
    } else {
    }
    %c2_i32 = arith.constant 2 : i32
    %17 = arith.cmpi ne, %arg0, %c2_i32 : i32
    %18 = arith.extui %17 : i1 to i32
    %c0_i32_6 = arith.constant 0 : i32
    %19 = arith.cmpi ne, %18, %c0_i32_6 : i32
    scf.if %19 {
      %cst_7 = arith.constant 0.000000e+00 : f32
      %20 = vector.broadcast %cst_7 : f32 to vector<128x128xf32>
      %c0_8 = arith.constant 0 : index
      %c0_9 = arith.constant 0 : index
      %21 = vector.load %arg9[%c0_8, %c0_9] : memref<128x128xf32, #tpu.memory_space<vmem>>, vector<128x128xf32>
      tpu.vector_store %arg9[%c0_8, %c0_9], %20 {strides = array<i32>} : memref<128x128xf32, #tpu.memory_space<vmem>>, vector<128x128xf32>,
    } else {
    }
    return
  }
  func.func @transform_0(%arg0: i32, %arg1: i32) -> (i32, i32) {
    %c0_i32 = arith.constant 0 : i32
    %c0_i32_0 = arith.constant 0 : i32
    return %arg1, %c0_i32 : i32, i32
  }
  func.func @transform_1(%arg0: i32, %arg1: i32) -> (i32, i32) {
    %c0_i32 = arith.constant 0 : i32
    %c0_i32_0 = arith.constant 0 : i32
    %c0_i32_1 = arith.constant 0 : i32
    return %c0_i32, %c0_i32_0 : i32, i32
  }
  func.func @transform_2(%arg0: i32, %arg1: i32) -> (i32, i32) {
    %c0_i32 = arith.constant 0 : i32
    %c0_i32_0 = arith.constant 0 : i32
    %c0_i32_1 = arith.constant 0 : i32
    return %c0_i32, %c0_i32_0 : i32, i32
  }
  func.func @transform_3(%arg0: i32, %arg1: i32) -> (i32, i32) {
    %c0_i32 = arith.constant 0 : i32
    %c0_i32_0 = arith.constant 0 : i32
    %c0_i32_1 = arith.constant 0 : i32
    return %c0_i32, %c0_i32_0 : i32, i32
  }
  func.func @transform_4(%arg0: i32, %arg1: i32) -> (i32, i32) {
    %c0_i32 = arith.constant 0 : i32
    %c0_i32_0 = arith.constant 0 : i32
    %c0_i32_1 = arith.constant 0 : i32
    return %c0_i32, %c0_i32_0 : i32, i32
  }
  func.func @transform_5(%arg0: i32, %arg1: i32) -> (i32, i32) {
    %c0_i32 = arith.constant 0 : i32
    %c0_i32_0 = arith.constant 0 : i32
    %c0_i32_1 = arith.constant 0 : i32
    return %c0_i32, %c0_i32_0 : i32, i32
  }
  func.func @transform_6(%arg0: i32, %arg1: i32) -> (i32, i32) {
    %c0_i32 = arith.constant 0 : i32
    %c0_i32_0 = arith.constant 0 : i32
    %c0_i32_1 = arith.constant 0 : i32
    return %c0_i32, %c0_i32_0 : i32, i32
  }
  func.func @transform_7(%arg0: i32, %arg1: i32) -> (i32, i32) {
    %c0_i32 = arith.constant 0 : i32
    %c0_i32_0 = arith.constant 0 : i32
    return %arg1, %c0_i32 : i32, i32
  }
}

</mosaic_0001>

<bundles_post_ra>
// kernel: tpu_custom_call.1
= control target key start
LH: loop header
LB: loop body
LE: loop exit
PB: predicated region body
PF: predicated region fallthrough
CT: control target
= control target key end

     0   :  { %s2314_s0 = inlined_call_operand.hbm [shape: bf16[256,128], index: 0, kind: input, shape index: {}]   ;;  %s2315_s1 = inlined_call_operand.hbm [shape: bf16[128,128], index: 1, kind: input, shape index: {}]   ;;  %s2316_s2 = inlined_call_operand.vmem [shape: f32[1,128], index: 2, kind: input, shape index: {}]   ;;  %s2317_s3 = inlined_call_operand.vmem [shape: f32[1,128], index: 3, kind: input, shape index: {}]   ;;  %s2318_s4 = inlined_call_operand.hbm [shape: bf16[128,128], index: 4, kind: input, shape index: {}]   ;;  %s2319_s5 = inlined_call_operand.vmem [shape: f32[1,128], index: 5, kind: input, shape index: {}]   ;;  %s2320_s6 = inlined_call_operand.vmem [shape: f32[1,128], index: 6, kind: input, shape index: {}]   ;;  %s2321_s7 = inlined_call_operand.hbm [shape: f32[256,128], index: 7, kind: output, shape index: {}]  }
   0x1   :  { %2328 = sst [smem:[#allocation25_spill]] %s2315_s1 }
   0x2   :  { %2329 = sst [smem:[#allocation26_spill]] %s2318_s4 }
   0x3   :  { %12 = vsyncpa [#allocation11], 0 }
   0x4   :  { %14 = vsyncpa [#allocation11 + $0x1], 0 }
   0x5   :  { %15 = vsyncpa [#allocation14], 0 }
   0x6   :  { %16 = vsyncpa [#allocation12], 0 }
   0x7   :  { %18 = vsyncpa [#allocation12 + $0x1], 0  ;;  %s1814_s24 = smov 0   ;;  %s1816_s25 = smov 0  }
   0x8   :  { %s1818_s26 = smov 0   ;;  %s1820_s27 = smov 0  }
   0x9   :  { %s1822_s28 = smov 0   ;;  %s1824_s29 = smov 0  }
   0xa   :  { %s1826_s30 = smov 0   ;;  %s1828_s8 = smov 0  }
   0xb LB: > { %2330 = sst [smem:[#allocation20_spill]] %s1734_s24  ;;  %s1240_s9 = sadd.s32 4294967295, %s1762_s8   ;;  %s1762_s8 = sphi %s1828_s8, %s24_s8   ;;  %s1758_s30 = sphi %s1826_s30, %s2350_s30   ;;  %s1754_s29 = sphi %s1824_s29, %s2355_s29   ;;  %s1750_s28 = sphi %s1822_s28, %s2348_s28   ;;  %s1746_s27 = sphi %s1820_s27, %s2354_s27   ;;  %s1742_s26 = sphi %s1818_s26, %s2353_s26   ;;  %s1738_s25 = sphi %s1816_s25, %s2352_s25   ;;  %s1734_s24 = sphi %s1814_s24, %s2351_s24  }
   0xc   : > { %2331 = sst [smem:[#allocation21_spill]] %s1758_s30  ;;  %s1241_s10 = sadd.s32 4294967294, %s1762_s8  }
   0xd   : > { %p56_p0 = scmp.ne.s32.totalorder %s1738_s25, %s1734_s24  ;;  %p1860_p1 = scmp.eq.s32.totalorder %s1240_s9, 0 }
   0xe   : > { %p212_p2 = scmp.eq.s32.totalorder %s1241_s10, 5  ;;  %p1242_p4 = scmp.ge.s32.totalorder %s1762_s8, 1 }
   0xf   : > { %p1866_p3 = por %p1860_p1, %p56_p0  ;;  %p219_p6 = scmp.lt.s32.totalorder %s1762_s8, 7 }
  0x10   : > { %p1871_p5 = por %p212_p2, %p56_p0  ;;  %s2336_s1 = sld [smem:[#allocation25_spill]] }
  0x11   : > { %p1879_p7 = pnand %p1242_p4, %p219_p6  ;;  %s1764_s18 = smov [#allocation13]  }
  0x12   : > { %s2334_s13 = scalar_select %p1871_p5, 1, 0 }
  0x13   : > { %p1467_p8 = pneg %p1879_p7  ;;  %s232_s19 = sshll.u32 %s1764_s18, 4  ;;  %s233_s19 = int_to_ptr.vmem [resolvable:$true] %s232_s19 }
  0x14   : > { %2335 = sst [smem:[#allocation22_spill]] %s2334_s13  ;;  %s2322_s23 = smov 64  }
  0x15   : > { %p1468_p9 = pnand %p1467_p8, %p1860_p1  ;;  %s2338_s4 = sld [smem:[#allocation26_spill]] }
  0x16   : > { %s230_s16 = sshll.u32 %s2336_s1, 4  ;;  %s2323_s10 = smov 4   ;;  %s231_s16 = int_to_ptr.hbm [resolvable:$true] %s230_s16 }
  0x17   : > { %1470 = dma.hbm_to_vmem [thread:$0]  (!%p1468_p9), %s231_s16, 1024, %s233_s19, [#allocation14], %s2322_s23, %s2322_s23, %s2323_s10  }
  0x18   : > { %s1767_s14 = smov [#allocation15]   ;;  %p1898_p10 = scmp.eq.s32.totalorder %s1240_s9, 5 }
  0x19   : > { %s252_s15 = sshll.u32 %s1767_s14, 4  ;;  %s33_s20 = sadd.s32 1, %s1754_s29  ;;  %s253_s15 = int_to_ptr.vmem [resolvable:$true] %s252_s15 }
  0x1a   : > { %p34_p11 = scmp.ge.s32.totalorder %s33_s20, 2  ;;  %s36_s16 = sadd.s32 1, %s1758_s30 }
  0x1b   : > { %s250_s22 = sshll.u32 %s2338_s4, 4  ;;  %p50_p12 = scmp.ne.s32.totalorder %s1742_s26, %s1738_s25  ;;  %s251_s22 = int_to_ptr.hbm [resolvable:$true] %s250_s22 }
  0x1c   : > { %1473 = dma.hbm_to_vmem [thread:$0]  (!%p1468_p9), %s251_s22, 1024, %s253_s15, [#allocation14], %s2322_s23, %s2322_s23, %s2323_s10  }
  0x1d   : > { %p51_p13 = scmp.eq.s32.totalorder %s1762_s8, 0  ;;  %s2357_s20 = smov (%p34_p11, %s33_s20), 0 }
  0x1e   : > { %2340 = sst [smem:[#allocation23_spill]] %s2357_s20  ;;  %s2359_s16 = smov (!%p34_p11, %s36_s16), %s1758_s30 }
  0x1f   : > { %s40_s19 = ssub.s32 %s1754_s29, %s2357_s20  ;;  %s43_s21 = sadd.s32 1, %s1742_s26 }
  0x20   : > { %p38_p0 = scmp.ge.s32.totalorder %s2359_s16, 3  ;;  %p41_p2 = scmp.eq.s32.totalorder %s40_s19, 0 }
  0x21   : > { %p1913_p4 = por %p51_p13, %p50_p12  ;;  %p1919_p6 = por %p1898_p10, %p50_p12 }
  0x22   : > { %s2361_s16 = smov (%p38_p0, %s2359_s16), 0  ;;  %s272_s15 = sand.u32 1, %s1742_s26  }
  0x23   : > { %2343 = sst [smem:[#allocation24_spill]] %s2361_s16  ;;  %s1381_s23 = sshll.u32 %s1754_s29, 6 }
  0x24   : > { %s1926_s14 = scalar_select %p41_p2, %s1742_s26, %s43_s21  }
  0x25   : > { %p1484_p8 = scmp.lt.s32.totalorder %s1762_s8, 6  ;;  %s1246_s10 = sshll.u32 %s272_s15, 6 }
  0x26   : > { %s281_s4 = scalar_lea.hbm %s2314_s0, %s1381_s23  ;;  %s276_s30 = scalar_lea.vmem [#allocation10], %s1246_s10 }
  0x27   : > { %s282_s20 = sshll.u32 %s281_s4, 4  ;;  %s284_s18 = sshll.u32 %s276_s30, 4  ;;  %s283_s20 = int_to_ptr.hbm [resolvable:$true] %s282_s20  ;;  %s285_s18 = int_to_ptr.vmem [resolvable:$true] %s284_s18 }
  0x28   : > { %p1475_p9 = pnand %p1484_p8, %p1913_p4  ;;  %s273_s13 = scalar_lea.sflag [#allocation11], %s272_s15 }
  0x29   : > { %s2344_s24 = smov 4   ;;  %s2345_s16 = smov 64  }
  0x2a   : > { %1477 = dma.hbm_to_vmem [thread:$0]  (!%p1475_p9), %s283_s20, 1024, %s285_s18, %s273_s13, %s2345_s16, %s2345_s16, %s2344_s24  }
  0x2b   : > { %296 = sbr.rel (%p1879_p7) target bundleno = 700 (0x2bc), region = 48  ;;  %s1942_s21 = sand.u32 (!%p1879_p7), 1, %s1738_s25  }
  0x2c   : > { %s1250_s1 = sshll.u32 (!%p1879_p7), %s1942_s21, 6  ;;  %s299_s4 = scalar_lea.sflag (!%p1879_p7), [#allocation11], %s1942_s21 }
  0x2d   : > { %s1946_s30 = scalar_lea.vmem (!%p1879_p7), [#allocation10], %s1250_s1 }
  0x30   : > { %1721 = dma.done.wait (%p1866_p3), %s299_s4, 1024  }
  0x31   : > { %1723 = vsyncadd (%p1866_p3), %s299_s4, 4294966272 }
  0x32   : > { %1725 = dma.done.wait (%p1860_p1), [#allocation14], 2048  }
  0x33   : > { %1727 = vsyncadd (%p1860_p1), [#allocation14], 4294965248  ;;  %s1253_s24 = sshll.u32 %s1942_s21, 7  ;;  %v346_v0 = vlaneseq  ;;  %s1254_s13 = sshll.u32 %s1746_s27, 7  ;;  %v1397_v19 = vld [vmem:[#allocation13 + $0x38] sm:$0xff]  ;;  %v1396_v28 = vld [vmem:[#allocation13 + $0x30] sm:$0xff] }
  0x34   : > { %v364_v2 = vstv %s1254_s13  ;;  %557 = vmatpush.bf16.msra.mxu0 %v1397_v19  ;;  %1407 = vmatpush.bf16.msra.mxu1 %v1397_v19  ;;  %v1395_v36 = vld [vmem:[#allocation13 + $0x28] sm:$0xff]  ;;  %v1768_v37 = vmov 0.0   ;;  %v1394_v47 = vld [vmem:[#allocation13 + $0x20] sm:$0xff]  ;;  %v1393_v55 = vld [vmem:[#allocation13 + $0x18] sm:$0xff]  ;;  %s2050_s11 = scalar_lea.vmem [#allocation16], %s1253_s24  ;;  %p1335_p1 = scmp.ne.s32.totalorder %s1750_s28, 0 }
  0x35   : > { %v347_v1 = vshrl.u32 %v346_v0, 7  ;;  %1408 = vmatpush.bf16.msra.mxu2 %v1397_v19  ;;  %1409 = vmatpush.bf16.msra.mxu3 %v1397_v19  ;;  %v1392_v56 = vld [vmem:[#allocation13 + $0x10] sm:$0xff]  ;;  %v1391_v57 = vld [vmem:[#allocation13 + $0x8] sm:$0xff]  ;;  %v1390_v58 = vld [vmem:[#allocation13] sm:$0xff]  ;;  %p1336_p3 = scmp.ne.s32.totalorder (!%p1335_p1), %s1746_s27, 0 }
  0x36   : > { %v1382_v59 = vld [vmem:[%s1946_s30] sm:$0xff]  ;;  %v1384_v60 = vld [vmem:[%s1946_s30 + $0x10] sm:$0xff]  ;;  %v1383_v63 = vld [vmem:[%s1946_s30 + $0x8] sm:$0xff] }
  0x37   : > { %v348_v3 = vadd.s32 8, %v347_v1  ;;  %v349_v4 = vadd.s32 16, %v347_v1  ;;  %v350_v5 = vadd.s32 24, %v347_v1  ;;  %v351_v6 = vadd.s32 32, %v347_v1  ;;  %v1386_v61 = vld [vmem:[%s1946_s30 + $0x20] sm:$0xff]  ;;  %v1388_v62 = vld [vmem:[%s1946_s30 + $0x30] sm:$0xff] }
  0x38   : > { %v352_v7 = vadd.s32 40, %v347_v1  ;;  %v353_v8 = vadd.s32 48, %v347_v1  ;;  %v354_v9 = vadd.s32 56, %v347_v1  ;;  %v355_v10 = vadd.s32 64, %v347_v1  ;;  %558 = vmatpush.bf16.msra.mxu0 %v1396_v28  ;;  %1410 = vmatpush.bf16.msra.mxu1 %v1396_v28  ;;  %v1385_v0 = vld [vmem:[%s1946_s30 + $0x18] sm:$0xff] }
  0x39   : > { %v356_v11 = vadd.s32 72, %v347_v1  ;;  %v357_v12 = vadd.s32 80, %v347_v1  ;;  %v358_v13 = vadd.s32 88, %v347_v1  ;;  %v359_v14 = vadd.s32 96, %v347_v1  ;;  %1411 = vmatpush.bf16.msra.mxu2 %v1396_v28  ;;  %1412 = vmatpush.bf16.msra.mxu3 %v1396_v28 }
  0x3a   : > { %v360_v15 = vadd.s32 104, %v347_v1  ;;  %v361_v16 = vadd.s32 112, %v347_v1  ;;  %v362_v17 = vadd.s32 120, %v347_v1  ;;  %v365_v18 = vadd.s32 %v364_v2, %v347_v1  ;;  %v1387_v1 = vld [vmem:[%s1946_s30 + $0x28] sm:$0xff] }
  0x3b   : > { %v366_v20 = vadd.s32 %v364_v2, %v348_v3  ;;  %v367_v21 = vadd.s32 %v364_v2, %v349_v4  ;;  %v368_v22 = vadd.s32 %v364_v2, %v350_v5  ;;  %v369_v23 = vadd.s32 %v364_v2, %v351_v6 }
  0x3c   : > { %v370_v24 = vadd.s32 %v364_v2, %v352_v7  ;;  %v371_v25 = vadd.s32 %v364_v2, %v353_v8  ;;  %v372_v26 = vadd.s32 %v364_v2, %v354_v9  ;;  %v373_v27 = vadd.s32 %v364_v2, %v355_v10  ;;  %559 = vmatpush.bf16.msra.mxu0 %v1395_v36 }
  0x3d   : > { %v374_v29 = vadd.s32 %v364_v2, %v356_v11  ;;  %v375_v30 = vadd.s32 %v364_v2, %v357_v12  ;;  %v376_v31 = vadd.s32 %v364_v2, %v358_v13  ;;  %v377_v32 = vadd.s32 %v364_v2, %v359_v14  ;;  %1413 = vmatpush.bf16.msra.mxu1 %v1395_v36 }
  0x3e   : > { %v378_v33 = vadd.s32 %v364_v2, %v360_v15  ;;  %v379_v34 = vadd.s32 %v364_v2, %v361_v16  ;;  %v380_v35 = vadd.s32 %v364_v2, %v362_v17  ;;  %vm381_vm0 = vcmp.lt.s32.totalorder %v365_v18, 250  ;;  %1414 = vmatpush.bf16.msra.mxu2 %v1395_v36  ;;  %1415 = vmatpush.bf16.msra.mxu3 %v1395_v36  ;;  %v1389_v2 = vld [vmem:[%s1946_s30 + $0x38] sm:$0xff] }
  0x3f   : > { %vm382_vm1 = vcmp.lt.s32.totalorder %v366_v20, 250  ;;  %vm383_vm2 = vcmp.lt.s32.totalorder %v367_v21, 250  ;;  %vm384_vm3 = vcmp.lt.s32.totalorder %v368_v22, 250  ;;  %vm385_vm4 = vcmp.lt.s32.totalorder %v369_v23, 250 }
  0x40   : > { %vm386_vm5 = vcmp.lt.s32.totalorder %v370_v24, 250  ;;  %vm387_vm6 = vcmp.lt.s32.totalorder %v371_v25, 250  ;;  %vm388_vm7 = vcmp.lt.s32.totalorder %v372_v26, 250  ;;  %vm389_vm8 = vcmp.lt.s32.totalorder %v373_v27, 250  ;;  %560 = vmatpush.bf16.msra.mxu0 %v1394_v47 }
  0x41   : > { %vm390_vm9 = vcmp.lt.s32.totalorder %v374_v29, 250  ;;  %vm391_vm10 = vcmp.lt.s32.totalorder %v375_v30, 250  ;;  %vm392_vm11 = vcmp.lt.s32.totalorder %v376_v31, 250  ;;  %vm393_vm12 = vcmp.lt.s32.totalorder %v377_v32, 250  ;;  %1416 = vmatpush.bf16.msra.mxu1 %v1394_v47 }
  0x42   : > { %vm394_vm13 = vcmp.lt.s32.totalorder %v378_v33, 250  ;;  %vm395_vm14 = vcmp.lt.s32.totalorder %v379_v34, 250  ;;  %vm396_vm15 = vcmp.lt.s32.totalorder %v380_v35, 250  ;;  %v1961_v38 = vsel %vm381_vm0, 1.0, %v1768_v37  ;;  %1417 = vmatpush.bf16.msra.mxu2 %v1394_v47  ;;  %1418 = vmatpush.bf16.msra.mxu3 %v1394_v47 }
  0x43   : > { %v1964_v39 = vsel %vm382_vm1, 1.0, %v1768_v37  ;;  %v1967_v40 = vsel %vm383_vm2, 1.0, %v1768_v37  ;;  %v1970_v41 = vsel %vm384_vm3, 1.0, %v1768_v37  ;;  %v1973_v42 = vsel %vm385_vm4, 1.0, %v1768_v37 }
  0x44   : > { %v1976_v43 = vsel %vm386_vm5, 1.0, %v1768_v37  ;;  %v1979_v44 = vsel %vm387_vm6, 1.0, %v1768_v37  ;;  %v1982_v45 = vsel %vm388_vm7, 1.0, %v1768_v37  ;;  %v1985_v46 = vsel %vm389_vm8, 1.0, %v1768_v37  ;;  %561 = vmatpush.bf16.msra.mxu0 %v1393_v55 }
  0x45   : > { %v1988_v48 = vsel %vm390_vm9, 1.0, %v1768_v37  ;;  %v1991_v49 = vsel %vm391_vm10, 1.0, %v1768_v37  ;;  %v1994_v50 = vsel %vm392_vm11, 1.0, %v1768_v37  ;;  %v1997_v51 = vsel %vm393_vm12, 1.0, %v1768_v37  ;;  %1419 = vmatpush.bf16.msra.mxu1 %v1393_v55 }
  0x46   : > { %v2000_v52 = vsel %vm394_vm13, 1.0, %v1768_v37  ;;  %v2003_v53 = vsel %vm395_vm14, 1.0, %v1768_v37  ;;  %v2006_v54 = vsel %vm396_vm15, 1.0, %v1768_v37  ;;  %1420 = vmatpush.bf16.msra.mxu2 %v1393_v55  ;;  %1421 = vmatpush.bf16.msra.mxu3 %v1393_v55 }
  0x48   : > { %562 = vmatpush.bf16.msra.mxu0 %v1392_v56 }
  0x49   : > { %1422 = vmatpush.bf16.msra.mxu1 %v1392_v56 }
  0x4a   : > { %1423 = vmatpush.bf16.msra.mxu2 %v1392_v56  ;;  %1424 = vmatpush.bf16.msra.mxu3 %v1392_v56 }
  0x4c   : > { %563 = vmatpush.bf16.msra.mxu0 %v1391_v57 }
  0x4d   : > { %1425 = vmatpush.bf16.msra.mxu1 %v1391_v57 }
  0x4e   : > { %1426 = vmatpush.bf16.msra.mxu2 %v1391_v57  ;;  %1427 = vmatpush.bf16.msra.mxu3 %v1391_v57 }
  0x50   : > { %564 = vmatpush.bf16.msra.mxu0 %v1390_v58 }
  0x51   : > { %1428 = vmatpush.bf16.msra.mxu1 %v1390_v58 }
  0x52   : > { %1429 = vmatpush.bf16.msra.mxu2 %v1390_v58  ;;  %1430 = vmatpush.bf16.msra.mxu3 %v1390_v58 }
  0x53   : > { %565 = vmatmul.bf16.vlgmr.msra.gmra.mxu0 %v1382_v59 }
  0x54   : > { %575 = vmatmul.bf16.vlgmr.msra.gmra.mxu1 %v1384_v60 }
  0x55   : > { %585 = vmatmul.bf16.vlgmr.msra.gmra.mxu2 %v1386_v61  ;;  %595 = vmatmul.bf16.vlgmr.msra.gmra.mxu3 %v1388_v62 }
  0x63   : > { %570 = vmatmul.bf16.gmra.mxu0 %v1383_v63 }
  0x64   : > { %580 = vmatmul.bf16.gmra.mxu1 %v1385_v0 }
  0x65   : > { %590 = vmatmul.bf16.gmra.mxu2 %v1387_v1  ;;  %600 = vmatmul.bf16.gmra.mxu3 %v1389_v2 }
  0xd0   : > { %v2016_v3 = vpop.f32.mrf.mxu0 }
  0xd1   : > { %v2018_v4 = vpop.f32.mrf.mxu1 }
  0xd8   : > { %v2020_v5 = vpop.f32.mrf.mxu2  ;;  %v2022_v6 = vpop.f32.mrf.mxu3 }
  0xd9   : > { %v2024_v7 = vpop.f32.mrf.mxu0  ;;  %v2026_v8 = vpop.f32.mrf.mxu1 }
  0xe0   : > { %v2028_v9 = vpop.f32.mrf.mxu2  ;;  %v2030_v10 = vpop.f32.mrf.mxu3 }
  0xe1   : > { %v2032_v11 = vpop.f32.mrf.mxu0  ;;  %v2034_v12 = vpop.f32.mrf.mxu1 }
  0xe8   : > { %v2036_v13 = vpop.f32.mrf.mxu2  ;;  %v2038_v14 = vpop.f32.mrf.mxu3 }
  0xe9   : > { %v2040_v15 = vpop.f32.mrf.mxu0  ;;  %v2042_v16 = vpop.f32.mrf.mxu1 }
  0xec   : > { %609 = sbr.rel (%p1335_p1) target bundleno = 338 (0x152), region = 64 }
  0xf0   : > { %v2044_v17 = vpop.f32.mrf.mxu2  ;;  %v2046_v18 = vpop.f32.mrf.mxu3 }
  0xf1   : > { %613 = sbr.rel (%p1336_p3) target bundleno = 249 (0xf9), region = 68 }
  0xf6   : > { %v1769_v19 = vmov 0.0  }
  0xf7   : > { %614 = vst [vmem:[#allocation2] sm:$0x1] %v1769_v19 }
  0xf8   : > { %615 = vst [vmem:[#allocation3] sm:$0x1] %v1769_v19 }
  0xf9 PF: > { %v616_v20 = vmul.f32 %v1961_v38, %v2016_v3  ;;  %v617_v21 = vmul.f32 %v1964_v39, %v2024_v7  ;;  %v618_v22 = vmul.f32 %v1967_v40, %v2032_v11  ;;  %v619_v23 = vmul.f32 %v1970_v41, %v2040_v15  ;;  %p1337_p7 = scmp.ne.s32.totalorder %s1746_s27, 1 }
  0xfa   : > { %v620_v27 = vmul.f32 %v1973_v42, %v2018_v4  ;;  %v621_v30 = vmul.f32 %v1976_v43, %v2026_v8  ;;  %v622_v34 = vmul.f32 %v1979_v44, %v2034_v12  ;;  %v623_v47 = vmul.f32 %v1982_v45, %v2042_v16 }
  0xfb   : > { %v633_v24 = vadd.f32 %v617_v21, %v616_v20  ;;  %v657_v25 = vmul.f32 %v616_v20, %v616_v20  ;;  %v658_v26 = vmul.f32 %v617_v21, %v617_v21  ;;  %v659_v29 = vmul.f32 %v618_v22, %v618_v22 }
  0xfc   : > { %v660_v32 = vmul.f32 %v619_v23, %v619_v23  ;;  %v661_v36 = vmul.f32 %v620_v27, %v620_v27  ;;  %v662_v56 = vmul.f32 %v621_v30, %v621_v30  ;;  %v624_v58 = vmul.f32 %v1985_v46, %v2020_v5 }
  0xfd   : > { %v634_v28 = vadd.f32 %v633_v24, %v618_v22  ;;  %v673_v33 = vadd.f32 %v658_v26, %v657_v25  ;;  %v663_v60 = vmul.f32 %v622_v34, %v622_v34  ;;  %v625_v62 = vmul.f32 %v1988_v48, %v2028_v9 }
  0xfe   : > { %v664_v0 = vmul.f32 %v623_v47, %v623_v47  ;;  %v626_v2 = vmul.f32 %v1991_v49, %v2036_v13  ;;  %v665_v20 = vmul.f32 %v624_v58, %v624_v58  ;;  %v627_v22 = vmul.f32 %v1994_v50, %v2044_v17 }
  0xff   : > { %v635_v31 = vadd.f32 %v634_v28, %v619_v23  ;;  %v674_v37 = vadd.f32 %v673_v33, %v659_v29  ;;  %v666_v24 = vmul.f32 %v625_v62, %v625_v62  ;;  %v628_v26 = vmul.f32 %v1997_v51, %v2022_v6 }
 0x100   : > { %v667_v28 = vmul.f32 %v626_v2, %v626_v2 }
 0x101   : > { %v636_v35 = vadd.f32 %v635_v31, %v620_v27  ;;  %v675_v57 = vadd.f32 %v674_v37, %v660_v32  ;;  %v668_v32 = vmul.f32 %v627_v22, %v627_v22 }
 0x103   : > { %v637_v55 = vadd.f32 %v636_v35, %v621_v30  ;;  %v676_v61 = vadd.f32 %v675_v57, %v661_v36  ;;  %v629_v30 = vmul.f32 %v2000_v52, %v2030_v10  ;;  %v669_v36 = vmul.f32 %v628_v26, %v628_v26 }
 0x105   : > { %v638_v59 = vadd.f32 %v637_v55, %v622_v34  ;;  %v677_v1 = vadd.f32 %v676_v61, %v662_v56  ;;  %v630_v34 = vmul.f32 %v2003_v53, %v2038_v14  ;;  %v670_v56 = vmul.f32 %v629_v30, %v629_v30 }
 0x107   : > { %v639_v63 = vadd.f32 %v638_v59, %v623_v47  ;;  %v678_v21 = vadd.f32 %v677_v1, %v663_v60  ;;  %v631_v47 = vmul.f32 %v2006_v54, %v2046_v18  ;;  %v671_v59 = vmul.f32 %v630_v34, %v630_v34 }
 0x109   : > { %v640_v19 = vadd.f32 %v639_v63, %v624_v58  ;;  %v679_v25 = vadd.f32 %v678_v21, %v664_v0 }
 0x10b   : > { %v641_v23 = vadd.f32 %v640_v19, %v625_v62  ;;  %v680_v29 = vadd.f32 %v679_v25, %v665_v20  ;;  %v672_v62 = vmul.f32 %v631_v47, %v631_v47 }
 0x10d   : > { %v642_v27 = vadd.f32 %v641_v23, %v626_v2  ;;  %v681_v33 = vadd.f32 %v680_v29, %v666_v24 }
 0x10f   : > { %v643_v31 = vadd.f32 %v642_v27, %v627_v22  ;;  %v682_v37 = vadd.f32 %v681_v33, %v667_v28 }
 0x111   : > { %v644_v35 = vadd.f32 %v643_v31, %v628_v26  ;;  %v683_v57 = vadd.f32 %v682_v37, %v668_v32  ;;  %v632_v26 = vld [vmem:[#allocation2] sm:$0x1]  ;;  %v656_v31 = vld [vmem:[#allocation3] sm:$0x1] }
 0x113   : > { %v645_v55 = vadd.f32 %v644_v35, %v629_v30  ;;  %v684_v60 = vadd.f32 %v683_v57, %v669_v36 }
 0x115   : > { %v646_v58 = vadd.f32 %v645_v55, %v630_v34  ;;  %v685_v63 = vadd.f32 %v684_v60, %v670_v56 }
 0x117   : > { %v647_v61 = vadd.f32 %v646_v58, %v631_v47  ;;  %v686_v1 = vadd.f32 %v685_v63, %v671_v59 }
 0x119   : > { %v648_v0 = vrot.slane %v647_v61, 4  ;;  %v687_v19 = vadd.f32 %v686_v1, %v672_v62 }
 0x11b   : > { %v649_v2 = vadd.f32 %v648_v0, %v647_v61  ;;  %v688_v21 = vrot.slane %v687_v19, 4 }
 0x11d   : > { %v650_v20 = vrot.slane %v649_v2, 2  ;;  %v689_v23 = vadd.f32 %v688_v21, %v687_v19 }
 0x11f   : > { %v651_v22 = vadd.f32 %v650_v20, %v649_v2  ;;  %v690_v25 = vrot.slane %v689_v23, 2 }
 0x121   : > { %v652_v24 = vrot.slane %v651_v22, 1  ;;  %v691_v28 = vadd.f32 %v690_v25, %v689_v23 }
 0x123   : > { %v653_v27 = vadd.f32 %v652_v24, %v651_v22  ;;  %v692_v30 = vrot.slane %v691_v28, 1 }
 0x125   : > { %v654_v29 = vadd.f32 %v653_v27, %v632_v26  ;;  %v693_v32 = vadd.f32 %v692_v30, %v691_v28  ;;  %699 = sbr.rel (%p1337_p7) target bundleno = 338 (0x152), region = 72 }
 0x127   : > { %655 = vst [vmem:[#allocation2] sm:$0x1] %v654_v29  ;;  %v694_v33 = vadd.f32 %v693_v32, %v656_v31 }
 0x129   : > { %695 = vst [vmem:[#allocation3] sm:$0x1] %v694_v33 }
 0x12a   : > { %v707_v63 = vld [vmem:[%s2316_s2] sm:$0x1] }
 0x12b   : > { %v721_v19 = vld [vmem:[%s2317_s3] sm:$0x1] }
 0x12e   : > { %v700_v34 = vld [vmem:[#allocation2] sm:$0x1] }
 0x12f   : > { %v701_v36 = vmul.f32 0.004, %v700_v34 }
 0x130   : > { %v702_v35 = vld [vmem:[#allocation3] sm:$0x1] }
 0x131   : > { %v703_v37 = vmul.f32 0.004, %v702_v35  ;;  %v704_v47 = vmul.f32 %v701_v36, %v701_v36 }
 0x133   : > { %v705_v55 = vsub.f32 %v703_v37, %v704_v47 }
 0x135   : > { %v706_v56 = vmax.f32 %v705_v55, 0.0 }
 0x137   : > { %v708_v57 = vadd.f32 1e-05, %v706_v56 }
 0x139   : > { %1562 = vrsqrt.f32 %v708_v57  ;;  %vm715_vm0 = vweird.f32 %v708_v57 }
 0x13f   : > { %v1563_v58 = vpop.eup %1562 }
 0x140   : > { %v710_v59 = vmul.f32 %v1563_v58, %v708_v57  ;;  %vm716_vm1 = vweird.f32 %v1563_v58 }
 0x141   : > { %vm717_vm2 = vmor %vm715_vm0, %vm716_vm1 }
 0x142   : > { %v711_v60 = vmul.f32 %v1563_v58, %v710_v59 }
 0x144   : > { %v712_v61 = vmul.f32 0.5, %v711_v60 }
 0x146   : > { %v713_v62 = vsub.f32 1.5, %v712_v61 }
 0x148   : > { %v714_v0 = vmul.f32 %v1563_v58, %v713_v62 }
 0x14a   : > { %v718_v1 = vsel %vm717_vm2, %v1563_v58, %v714_v0 }
 0x14b   : > { %v719_v2 = vmul.f32 %v718_v1, %v707_v63 }
 0x14d   : > { %720 = vst [vmem:[#allocation4] sm:$0x1] %v719_v2  ;;  %v722_v20 = vmul.f32 %v719_v2, %v701_v36 }
 0x14f   : > { %v723_v21 = vsub.f32 %v721_v19, %v722_v20 }
 0x151   : > { %724 = vst [vmem:[#allocation5] sm:$0x1] %v723_v21 }
 0x152 PF: > { %p1338_p10 = scmp.le.s32.totalorder %s1750_s28, 0 }
 0x153   : > { %p1371_p11 = scmp.ne.s32.totalorder (!%p1338_p10), %s1750_s28, 1 }
 0x154   : > { %728 = sbr.rel (%p1338_p10) target bundleno = 661 (0x295), region = 76 }
 0x159   : > { %v1405_v22 = vld [vmem:[#allocation15 + $0x38] sm:$0xff]  ;;  %v1404_v23 = vld [vmem:[#allocation15 + $0x30] sm:$0xff]  ;;  %v1403_v24 = vld [vmem:[#allocation15 + $0x28] sm:$0xff]  ;;  %p1372_p12 = scmp.ne.s32.totalorder (!%p1371_p11), %s1746_s27, 0 }
 0x15a   : > { %857 = vmatpush.bf16.msra.mxu0 %v1405_v22  ;;  %1431 = vmatpush.bf16.msra.mxu1 %v1405_v22  ;;  %v1402_v25 = vld [vmem:[#allocation15 + $0x20] sm:$0xff]  ;;  %v2094_v26 = vld [vmem:[#allocation4] ss:$0 sm:$0xff]  ;;  %v2098_v29 = vld [vmem:[#allocation5] ss:$0 sm:$0xff] }
 0x15b   : > { %1432 = vmatpush.bf16.msra.mxu2 %v1405_v22  ;;  %1433 = vmatpush.bf16.msra.mxu3 %v1405_v22  ;;  %v1401_v27 = vld [vmem:[#allocation15 + $0x18] sm:$0xff]  ;;  %v733_v28 = vmul.f32 %v2094_v26, %v2016_v3  ;;  %v734_v30 = vmul.f32 %v2094_v26, %v2024_v7  ;;  %v737_v31 = vmul.f32 %v2094_v26, %v2018_v4  ;;  %v1400_v34 = vld [vmem:[#allocation15 + $0x10] sm:$0xff]  ;;  %v1398_v59 = vld [vmem:[#allocation15] sm:$0xff] }
 0x15c   : > { %v738_v32 = vmul.f32 %v2094_v26, %v2026_v8  ;;  %v741_v33 = vmul.f32 %v2094_v26, %v2020_v5  ;;  %v742_v3 = vmul.f32 %v2094_v26, %v2028_v9  ;;  %v745_v35 = vmul.f32 %v2094_v26, %v2022_v6  ;;  %v1399_v9 = vld [vmem:[#allocation15 + $0x8] sm:$0xff] }
 0x15d   : > { %v746_v7 = vmul.f32 %v2094_v26, %v2030_v10  ;;  %v753_v4 = vadd.f32 %v2098_v29, %v733_v28  ;;  %v754_v8 = vadd.f32 %v2098_v29, %v734_v30  ;;  %v757_v5 = vadd.f32 %v2098_v29, %v737_v31 }
 0x15e   : > { %858 = vmatpush.bf16.msra.mxu0 %v1404_v23  ;;  %1434 = vmatpush.bf16.msra.mxu1 %v1404_v23  ;;  %v758_v36 = vadd.f32 %v2098_v29, %v738_v32  ;;  %v761_v37 = vadd.f32 %v2098_v29, %v741_v33  ;;  %v762_v6 = vadd.f32 %v2098_v29, %v742_v3 }
 0x15f   : > { %1435 = vmatpush.bf16.msra.mxu2 %v1404_v23  ;;  %1436 = vmatpush.bf16.msra.mxu3 %v1404_v23  ;;  %v765_v47 = vadd.f32 %v2098_v29, %v745_v35  ;;  %v766_v10 = vadd.f32 %v2098_v29, %v746_v7  ;;  %v769_v55 = vmax.f32 %v753_v4, 0.0  ;;  %v770_v56 = vmax.f32 %v754_v8, 0.0 }
 0x160   : > { %v773_v57 = vmax.f32 %v757_v5, 0.0  ;;  %v774_v58 = vmax.f32 %v758_v36, 0.0  ;;  %v777_v60 = vmax.f32 %v761_v37, 0.0  ;;  %v778_v61 = vmax.f32 %v762_v6, 0.0 }
 0x161   : > { %v781_v62 = vmax.f32 %v765_v47, 0.0  ;;  %v782_v63 = vmax.f32 %v766_v10, 0.0  ;;  %v785_v0 = vpack.c.bf16 %v770_v56, %v769_v55  ;;  %v735_v20 = vmul.f32 %v2094_v26, %v2032_v11 }
 0x162   : > { %859 = vmatpush.bf16.msra.mxu0 %v1403_v24  ;;  %1437 = vmatpush.bf16.msra.mxu1 %v1403_v24  ;;  %v787_v1 = vpack.c.bf16 %v774_v58, %v773_v57  ;;  %v789_v2 = vpack.c.bf16 %v778_v61, %v777_v60  ;;  %v736_v21 = vmul.f32 %v2094_v26, %v2040_v15 }
 0x163   : > { %1438 = vmatpush.bf16.msra.mxu2 %v1403_v24  ;;  %1439 = vmatpush.bf16.msra.mxu3 %v1403_v24  ;;  %v791_v19 = vpack.c.bf16 %v782_v63, %v781_v62  ;;  %v739_v22 = vmul.f32 %v2094_v26, %v2034_v12  ;;  %v740_v23 = vmul.f32 %v2094_v26, %v2042_v16 }
 0x164   : > { %v743_v24 = vmul.f32 %v2094_v26, %v2036_v13  ;;  %v747_v11 = vmul.f32 %v2094_v26, %v2038_v14  ;;  %v748_v15 = vmul.f32 %v2094_v26, %v2046_v18  ;;  %v756_v12 = vadd.f32 %v2098_v29, %v736_v21 }
 0x165   : > { %v759_v16 = vadd.f32 %v2098_v29, %v739_v22  ;;  %v760_v28 = vadd.f32 %v2098_v29, %v740_v23 }
 0x166   : > { %860 = vmatpush.bf16.msra.mxu0 %v1402_v25  ;;  %1440 = vmatpush.bf16.msra.mxu1 %v1402_v25  ;;  %v763_v13 = vadd.f32 %v2098_v29, %v743_v24  ;;  %v768_v31 = vadd.f32 %v2098_v29, %v748_v15  ;;  %v772_v32 = vmax.f32 %v756_v12, 0.0 }
 0x167   : > { %1441 = vmatpush.bf16.msra.mxu2 %v1402_v25  ;;  %1442 = vmatpush.bf16.msra.mxu3 %v1402_v25  ;;  %v744_v25 = vmul.f32 %v2094_v26, %v2044_v17  ;;  %v767_v17 = vadd.f32 %v2098_v29, %v747_v11  ;;  %v775_v33 = vmax.f32 %v759_v16, 0.0  ;;  %v776_v18 = vmax.f32 %v760_v28, 0.0 }
 0x168   : > { %v779_v26 = vmax.f32 %v763_v13, 0.0  ;;  %v784_v35 = vmax.f32 %v768_v31, 0.0 }
 0x169   : > { %v764_v30 = vadd.f32 %v2098_v29, %v744_v25  ;;  %v783_v3 = vmax.f32 %v767_v17, 0.0  ;;  %v788_v4 = vpack.c.bf16 %v776_v18, %v775_v33 }
 0x16a   : > { %861 = vmatpush.bf16.msra.mxu0 %v1401_v27  ;;  %1443 = vmatpush.bf16.msra.mxu1 %v1401_v27 }
 0x16b   : > { %1444 = vmatpush.bf16.msra.mxu2 %v1401_v27  ;;  %1445 = vmatpush.bf16.msra.mxu3 %v1401_v27  ;;  %v755_v27 = vadd.f32 %v2098_v29, %v735_v20  ;;  %v792_v5 = vpack.c.bf16 %v784_v35, %v783_v3 }
 0x16d   : > { %v771_v14 = vmax.f32 %v755_v27, 0.0 }
 0x16e   : > { %862 = vmatpush.bf16.msra.mxu0 %v1400_v34  ;;  %1446 = vmatpush.bf16.msra.mxu1 %v1400_v34 }
 0x16f   : > { %1447 = vmatpush.bf16.msra.mxu2 %v1400_v34  ;;  %1448 = vmatpush.bf16.msra.mxu3 %v1400_v34  ;;  %v780_v34 = vmax.f32 %v764_v30, 0.0  ;;  %v786_v7 = vpack.c.bf16 %v772_v32, %v771_v14 }
 0x171   : > { %v790_v8 = vpack.c.bf16 %v780_v34, %v779_v26 }
 0x172   : > { %863 = vmatpush.bf16.msra.mxu0 %v1399_v9  ;;  %1449 = vmatpush.bf16.msra.mxu1 %v1399_v9 }
 0x173   : > { %1450 = vmatpush.bf16.msra.mxu2 %v1399_v9  ;;  %1451 = vmatpush.bf16.msra.mxu3 %v1399_v9 }
 0x176   : > { %864 = vmatpush.bf16.msra.mxu0 %v1398_v59  ;;  %1452 = vmatpush.bf16.msra.mxu1 %v1398_v59 }
 0x177   : > { %1453 = vmatpush.bf16.msra.mxu2 %v1398_v59  ;;  %1454 = vmatpush.bf16.msra.mxu3 %v1398_v59 }
 0x179   : > { %865 = vmatmul.bf16.vlgmr.msra.gmra.mxu0 %v785_v0  ;;  %875 = vmatmul.bf16.vlgmr.msra.gmra.mxu1 %v787_v1 }
 0x17a   : > { %885 = vmatmul.bf16.vlgmr.msra.gmra.mxu2 %v789_v2  ;;  %895 = vmatmul.bf16.vlgmr.msra.gmra.mxu3 %v791_v19 }
 0x189   : > { %870 = vmatmul.bf16.gmra.mxu0 %v786_v7  ;;  %880 = vmatmul.bf16.gmra.mxu1 %v788_v4 }
 0x18a   : > { %890 = vmatmul.bf16.gmra.mxu2 %v790_v8  ;;  %900 = vmatmul.bf16.gmra.mxu3 %v792_v5 }
 0x1f6   : > { %v2146_v36 = vpop.f32.mrf.mxu0  ;;  %v2148_v37 = vpop.f32.mrf.mxu1 }
 0x1fd   : > { %v2150_v29 = vpop.f32.mrf.mxu2  ;;  %v2152_v9 = vpop.f32.mrf.mxu3 }
 0x1fe   : > { %v2154_v6 = vpop.f32.mrf.mxu0  ;;  %v2156_v47 = vpop.f32.mrf.mxu1 }
 0x205   : > { %v2158_v10 = vpop.f32.mrf.mxu2  ;;  %v2160_v55 = vpop.f32.mrf.mxu3 }
 0x206   : > { %v2162_v56 = vpop.f32.mrf.mxu0  ;;  %v2164_v57 = vpop.f32.mrf.mxu1 }
 0x20d   : > { %v2166_v58 = vpop.f32.mrf.mxu2  ;;  %v2168_v59 = vpop.f32.mrf.mxu3 }
 0x20e   : > { %v2170_v60 = vpop.f32.mrf.mxu0  ;;  %v2172_v61 = vpop.f32.mrf.mxu1 }
 0x211   : > { %909 = sbr.rel (%p1371_p11) target bundleno = 631 (0x277), region = 80 }
 0x215   : > { %v2174_v62 = vpop.f32.mrf.mxu2  ;;  %v2176_v63 = vpop.f32.mrf.mxu3 }
 0x216   : > { %913 = sbr.rel (%p1372_p12) target bundleno = 542 (0x21e), region = 84 }
 0x21b   : > { %v1770_v0 = vmov 0.0  }
 0x21c   : > { %914 = vst [vmem:[#allocation6] sm:$0x1] %v1770_v0 }
 0x21d   : > { %915 = vst [vmem:[#allocation7] sm:$0x1] %v1770_v0 }
 0x21e PF: > { %v916_v1 = vmul.f32 %v1961_v38, %v2146_v36  ;;  %v917_v2 = vmul.f32 %v1964_v39, %v2154_v6  ;;  %v918_v19 = vmul.f32 %v1967_v40, %v2162_v56  ;;  %v919_v20 = vmul.f32 %v1970_v41, %v2170_v60  ;;  %p1373_p13 = scmp.ne.s32.totalorder %s1746_s27, 1 }
 0x21f   : > { %v920_v24 = vmul.f32 %v1973_v42, %v2148_v37  ;;  %v921_v38 = vmul.f32 %v1976_v43, %v2156_v47  ;;  %v922_v40 = vmul.f32 %v1979_v44, %v2164_v57  ;;  %v923_v28 = vmul.f32 %v1982_v45, %v2172_v61 }
 0x220   : > { %v933_v21 = vadd.f32 %v917_v2, %v916_v1  ;;  %v957_v22 = vmul.f32 %v916_v1, %v916_v1  ;;  %v958_v23 = vmul.f32 %v917_v2, %v917_v2  ;;  %v959_v11 = vmul.f32 %v918_v19, %v918_v19 }
 0x221   : > { %v960_v27 = vmul.f32 %v919_v20, %v919_v20  ;;  %v961_v16 = vmul.f32 %v920_v24, %v920_v24  ;;  %v962_v30 = vmul.f32 %v921_v38, %v921_v38  ;;  %v924_v17 = vmul.f32 %v1985_v46, %v2150_v29 }
 0x222   : > { %v934_v25 = vadd.f32 %v933_v21, %v918_v19  ;;  %v973_v39 = vadd.f32 %v958_v23, %v957_v22  ;;  %v963_v43 = vmul.f32 %v922_v40, %v922_v40  ;;  %v925_v32 = vmul.f32 %v1988_v48, %v2158_v10 }
 0x223   : > { %v964_v44 = vmul.f32 %v923_v28, %v923_v28  ;;  %v926_v26 = vmul.f32 %v1991_v49, %v2166_v58  ;;  %v965_v45 = vmul.f32 %v924_v17, %v924_v17  ;;  %v927_v35 = vmul.f32 %v1994_v50, %v2174_v62 }
 0x224   : > { %v935_v15 = vadd.f32 %v934_v25, %v919_v20  ;;  %v974_v41 = vadd.f32 %v973_v39, %v959_v11  ;;  %v966_v46 = vmul.f32 %v925_v32, %v925_v32  ;;  %v928_v8 = vmul.f32 %v1997_v51, %v2152_v9 }
 0x225   : > { %v967_v48 = vmul.f32 %v926_v26, %v926_v26  ;;  %v929_v1 = vmul.f32 %v2000_v52, %v2160_v55  ;;  %v968_v49 = vmul.f32 %v927_v35, %v927_v35  ;;  %v930_v20 = vmul.f32 %v2003_v53, %v2168_v59 }
 0x226   : > { %v936_v12 = vadd.f32 %v935_v15, %v920_v24  ;;  %v975_v42 = vadd.f32 %v974_v41, %v960_v27  ;;  %v969_v50 = vmul.f32 %v928_v8, %v928_v8  ;;  %v931_v23 = vmul.f32 %v2006_v54, %v2176_v63  ;;  %v932_v54 = vld [vmem:[#allocation6] sm:$0x1] }
 0x227   : > { %v970_v51 = vmul.f32 %v929_v1, %v929_v1 }
 0x228   : > { %v937_v13 = vadd.f32 %v936_v12, %v921_v38  ;;  %v976_v14 = vadd.f32 %v975_v42, %v961_v16  ;;  %v971_v38 = vmul.f32 %v930_v20, %v930_v20  ;;  %v972_v52 = vmul.f32 %v931_v23, %v931_v23 }
 0x22a   : > { %v938_v31 = vadd.f32 %v937_v13, %v922_v40  ;;  %v977_v18 = vadd.f32 %v976_v14, %v962_v30 }
 0x22c   : > { %v939_v33 = vadd.f32 %v938_v31, %v923_v28  ;;  %v978_v3 = vadd.f32 %v977_v18, %v963_v43 }
 0x22e   : > { %v940_v34 = vadd.f32 %v939_v33, %v924_v17  ;;  %v979_v4 = vadd.f32 %v978_v3, %v964_v44  ;;  %v956_v33 = vld [vmem:[#allocation7] sm:$0x1] }
 0x230   : > { %v941_v7 = vadd.f32 %v940_v34, %v925_v32  ;;  %v980_v0 = vadd.f32 %v979_v4, %v965_v45 }
 0x232   : > { %v942_v5 = vadd.f32 %v941_v7, %v926_v26  ;;  %v981_v19 = vadd.f32 %v980_v0, %v966_v46 }
 0x234   : > { %v943_v2 = vadd.f32 %v942_v5, %v927_v35  ;;  %v982_v22 = vadd.f32 %v981_v19, %v967_v48 }
 0x236   : > { %v944_v21 = vadd.f32 %v943_v2, %v928_v8  ;;  %v983_v25 = vadd.f32 %v982_v22, %v968_v49 }
 0x238   : > { %v945_v24 = vadd.f32 %v944_v21, %v929_v1  ;;  %v984_v15 = vadd.f32 %v983_v25, %v969_v50 }
 0x23a   : > { %v946_v11 = vadd.f32 %v945_v24, %v930_v20  ;;  %v985_v39 = vadd.f32 %v984_v15, %v970_v51 }
 0x23c   : > { %v947_v27 = vadd.f32 %v946_v11, %v931_v23  ;;  %v986_v12 = vadd.f32 %v985_v39, %v971_v38 }
 0x23e   : > { %v948_v40 = vrot.slane %v947_v27, 4  ;;  %v987_v41 = vadd.f32 %v986_v12, %v972_v52 }
 0x240   : > { %v949_v16 = vadd.f32 %v948_v40, %v947_v27  ;;  %v988_v28 = vrot.slane %v987_v41, 4 }
 0x242   : > { %v950_v53 = vrot.slane %v949_v16, 2  ;;  %v989_v30 = vadd.f32 %v988_v28, %v987_v41 }
 0x244   : > { %v951_v13 = vadd.f32 %v950_v53, %v949_v16  ;;  %v990_v17 = vrot.slane %v989_v30, 2 }
 0x246   : > { %v952_v42 = vrot.slane %v951_v13, 1  ;;  %v991_v43 = vadd.f32 %v990_v17, %v989_v30 }
 0x248   : > { %v953_v31 = vadd.f32 %v952_v42, %v951_v13  ;;  %v992_v32 = vrot.slane %v991_v43, 1 }
 0x24a   : > { %v954_v14 = vadd.f32 %v953_v31, %v932_v54  ;;  %v993_v44 = vadd.f32 %v992_v32, %v991_v43  ;;  %999 = sbr.rel (%p1373_p13) target bundleno = 631 (0x277), region = 88 }
 0x24c   : > { %955 = vst [vmem:[#allocation6] sm:$0x1] %v954_v14  ;;  %v994_v18 = vadd.f32 %v993_v44, %v956_v33 }
 0x24e   : > { %995 = vst [vmem:[#allocation7] sm:$0x1] %v994_v18 }
 0x24f   : > { %v1007_v2 = vld [vmem:[%s2319_s5] sm:$0x1] }
 0x250   : > { %v1021_v21 = vld [vmem:[%s2320_s6] sm:$0x1] }
 0x253   : > { %v1000_v26 = vld [vmem:[#allocation6] sm:$0x1] }
 0x254   : > { %v1001_v45 = vmul.f32 0.004, %v1000_v26 }
 0x255   : > { %v1002_v34 = vld [vmem:[#allocation7] sm:$0x1] }
 0x256   : > { %v1003_v3 = vmul.f32 0.004, %v1002_v34  ;;  %v1004_v35 = vmul.f32 %v1001_v45, %v1001_v45 }
 0x258   : > { %v1005_v7 = vsub.f32 %v1003_v3, %v1004_v35 }
 0x25a   : > { %v1006_v46 = vmax.f32 %v1005_v7, 0.0 }
 0x25c   : > { %v1008_v4 = vadd.f32 1e-05, %v1006_v46 }
 0x25e   : > { %1566 = vrsqrt.f32 %v1008_v4  ;;  %vm1015_vm3 = vweird.f32 %v1008_v4 }
 0x264   : > { %v1567_v8 = vpop.eup %1566 }
 0x265   : > { %v1010_v5 = vmul.f32 %v1567_v8, %v1008_v4  ;;  %vm1016_vm4 = vweird.f32 %v1567_v8 }
 0x266   : > { %vm1017_vm5 = vmor %vm1015_vm3, %vm1016_vm4 }
 0x267   : > { %v1011_v48 = vmul.f32 %v1567_v8, %v1010_v5 }
 0x269   : > { %v1012_v0 = vmul.f32 0.5, %v1011_v48 }
 0x26b   : > { %v1013_v1 = vsub.f32 1.5, %v1012_v0 }
 0x26d   : > { %v1014_v49 = vmul.f32 %v1567_v8, %v1013_v1 }
 0x26f   : > { %v1018_v19 = vsel %vm1017_vm5, %v1567_v8, %v1014_v49 }
 0x270   : > { %v1019_v20 = vmul.f32 %v1018_v19, %v1007_v2 }
 0x272   : > { %1020 = vst [vmem:[#allocation8] sm:$0x1] %v1019_v20  ;;  %v1022_v50 = vmul.f32 %v1019_v20, %v1001_v45 }
 0x274   : > { %v1023_v22 = vsub.f32 %v1021_v21, %v1022_v50 }
 0x276   : > { %1024 = vst [vmem:[#allocation9] sm:$0x1] %v1023_v22 }
 0x277 PF: > { %p1374_p0 = scmp.ne.s32.totalorder %s1750_s28, 2 }
 0x279   : > { %1028 = sbr.rel (%p1374_p0) target bundleno = 661 (0x295), region = 92 }
 0x27e   : > { %v1568_v23 = vld [vmem:[#allocation8] ss:$0 sm:$0xff]  ;;  %v1569_v24 = vld [vmem:[#allocation9] ss:$0 sm:$0xff] }
 0x27f   : > { %v1033_v51 = vmul.f32 %v1568_v23, %v2146_v36  ;;  %v1034_v25 = vmul.f32 %v1568_v23, %v2154_v6  ;;  %v1035_v11 = vmul.f32 %v1568_v23, %v2162_v56  ;;  %v1036_v38 = vmul.f32 %v1568_v23, %v2170_v60 }
 0x280   : > { %v1037_v15 = vmul.f32 %v1568_v23, %v2148_v37  ;;  %v1038_v27 = vmul.f32 %v1568_v23, %v2156_v47  ;;  %v1039_v52 = vmul.f32 %v1568_v23, %v2164_v57  ;;  %v1040_v39 = vmul.f32 %v1568_v23, %v2172_v61 }
 0x281   : > { %v1053_v40 = vadd.f32 %v1569_v24, %v1033_v51  ;;  %v1054_v12 = vadd.f32 %v1569_v24, %v1034_v25  ;;  %v1055_v16 = vadd.f32 %v1569_v24, %v1035_v11  ;;  %v1056_v36 = vadd.f32 %v1569_v24, %v1036_v38 }
 0x282   : > { %v1057_v41 = vadd.f32 %v1569_v24, %v1037_v15  ;;  %v1058_v6 = vadd.f32 %v1569_v24, %v1038_v27  ;;  %v1059_v53 = vadd.f32 %v1569_v24, %v1039_v52  ;;  %v1060_v47 = vadd.f32 %v1569_v24, %v1040_v39 }
 0x283   : > { %v1069_v56 = vmax.f32 %v1053_v40, 0.0  ;;  %v1070_v60 = vmax.f32 %v1054_v12, 0.0  ;;  %v1071_v28 = vmax.f32 %v1055_v16, 0.0  ;;  %v1072_v37 = vmax.f32 %v1056_v36, 0.0 }
 0x284   : > { %v1073_v13 = vmax.f32 %v1057_v41, 0.0  ;;  %v1041_v57 = vmul.f32 %v1568_v23, %v2150_v29  ;;  %v1042_v61 = vmul.f32 %v1568_v23, %v2158_v10  ;;  %v1043_v30 = vmul.f32 %v1568_v23, %v2166_v58 }
 0x285   : > { %1085 = vst [vmem:[%s2050_s11] sm:$0xff] %v1069_v56  ;;  %v1044_v42 = vmul.f32 %v1568_v23, %v2174_v62  ;;  %v1074_v17 = vmax.f32 %v1058_v6, 0.0  ;;  %v1075_v54 = vmax.f32 %v1059_v53, 0.0  ;;  %v1045_v31 = vmul.f32 %v1568_v23, %v2152_v9 }
 0x286   : > { %1086 = vst [vmem:[%s2050_s11 + $0x8] sm:$0xff] %v1070_v60  ;;  %v1046_v43 = vmul.f32 %v1568_v23, %v2160_v55  ;;  %v1061_v14 = vadd.f32 %v1569_v24, %v1041_v57  ;;  %v1062_v32 = vadd.f32 %v1569_v24, %v1042_v61  ;;  %v1063_v29 = vadd.f32 %v1569_v24, %v1043_v30 }
 0x287   : > { %1087 = vst [vmem:[%s2050_s11 + $0x10] sm:$0xff] %v1071_v28  ;;  %v1047_v10 = vmul.f32 %v1568_v23, %v2168_v59  ;;  %v1076_v58 = vmax.f32 %v1060_v47, 0.0  ;;  %v1064_v62 = vadd.f32 %v1569_v24, %v1044_v42  ;;  %v1048_v33 = vmul.f32 %v1568_v23, %v2176_v63 }
 0x288   : > { %1088 = vst [vmem:[%s2050_s11 + $0x18] sm:$0xff] %v1072_v37  ;;  %v1077_v9 = vmax.f32 %v1061_v14, 0.0  ;;  %v1065_v44 = vadd.f32 %v1569_v24, %v1045_v31  ;;  %v1078_v55 = vmax.f32 %v1062_v32, 0.0  ;;  %v1066_v18 = vadd.f32 %v1569_v24, %v1046_v43 }
 0x289   : > { %1089 = vst [vmem:[%s2050_s11 + $0x20] sm:$0xff] %v1073_v13  ;;  %v1079_v59 = vmax.f32 %v1063_v29, 0.0  ;;  %v1067_v26 = vadd.f32 %v1569_v24, %v1047_v10  ;;  %v1080_v34 = vmax.f32 %v1064_v62, 0.0  ;;  %v1068_v45 = vadd.f32 %v1569_v24, %v1048_v33 }
 0x28a   : > { %1090 = vst [vmem:[%s2050_s11 + $0x28] sm:$0xff] %v1074_v17  ;;  %v1081_v63 = vmax.f32 %v1065_v44, 0.0  ;;  %v1082_v3 = vmax.f32 %v1066_v18, 0.0 }
 0x28b   : > { %1091 = vst [vmem:[%s2050_s11 + $0x30] sm:$0xff] %v1075_v54  ;;  %v1083_v35 = vmax.f32 %v1067_v26, 0.0  ;;  %v1084_v7 = vmax.f32 %v1068_v45, 0.0 }
 0x28c   : > { %1092 = vst [vmem:[%s2050_s11 + $0x38] sm:$0xff] %v1076_v58 }
 0x28d   : > { %1093 = vst [vmem:[%s2050_s11 + $0x40] sm:$0xff] %v1077_v9 }
 0x28e   : > { %1094 = vst [vmem:[%s2050_s11 + $0x48] sm:$0xff] %v1078_v55 }
 0x28f   : > { %1095 = vst [vmem:[%s2050_s11 + $0x50] sm:$0xff] %v1079_v59 }
 0x290   : > { %1096 = vst [vmem:[%s2050_s11 + $0x58] sm:$0xff] %v1080_v34 }
 0x291   : > { %1097 = vst [vmem:[%s2050_s11 + $0x60] sm:$0xff] %v1081_v63 }
 0x292   : > { %1098 = vst [vmem:[%s2050_s11 + $0x68] sm:$0xff] %v1082_v3 }
 0x293   : > { %1099 = vst [vmem:[%s2050_s11 + $0x70] sm:$0xff] %v1083_v35 }
 0x294   : > { %1100 = vst [vmem:[%s2050_s11 + $0x78] sm:$0xff] %v1084_v7 }
 0x295 PF: > { %p1375_p2 = scmp.eq.s32.totalorder %s1750_s28, 2 }
 0x297   : > { %1104 = sbr.rel (%p1375_p2) target bundleno = 685 (0x2ad), region = 96 }
 0x29c   : > { %v1771_v46 = vmov 0.0  }
 0x29d   : > { %1105 = vst [vmem:[%s2050_s11] sm:$0xff] %v1771_v46 }
 0x29e   : > { %1106 = vst [vmem:[%s2050_s11 + $0x8] sm:$0xff] %v1771_v46 }
 0x29f   : > { %1107 = vst [vmem:[%s2050_s11 + $0x10] sm:$0xff] %v1771_v46 }
 0x2a0   : > { %1108 = vst [vmem:[%s2050_s11 + $0x18] sm:$0xff] %v1771_v46 }
 0x2a1   : > { %1109 = vst [vmem:[%s2050_s11 + $0x20] sm:$0xff] %v1771_v46 }
 0x2a2   : > { %1110 = vst [vmem:[%s2050_s11 + $0x28] sm:$0xff] %v1771_v46 }
 0x2a3   : > { %1111 = vst [vmem:[%s2050_s11 + $0x30] sm:$0xff] %v1771_v46 }
 0x2a4   : > { %1112 = vst [vmem:[%s2050_s11 + $0x38] sm:$0xff] %v1771_v46 }
 0x2a5   : > { %1113 = vst [vmem:[%s2050_s11 + $0x40] sm:$0xff] %v1771_v46 }
 0x2a6   : > { %1114 = vst [vmem:[%s2050_s11 + $0x48] sm:$0xff] %v1771_v46 }
 0x2a7   : > { %1115 = vst [vmem:[%s2050_s11 + $0x50] sm:$0xff] %v1771_v46 }
 0x2a8   : > { %1116 = vst [vmem:[%s2050_s11 + $0x58] sm:$0xff] %v1771_v46 }
 0x2a9   : > { %1117 = vst [vmem:[%s2050_s11 + $0x60] sm:$0xff] %v1771_v46 }
 0x2aa   : > { %1118 = vst [vmem:[%s2050_s11 + $0x68] sm:$0xff] %v1771_v46 }
 0x2ab   : > { %1119 = vst [vmem:[%s2050_s11 + $0x70] sm:$0xff] %v1771_v46 }
 0x2ac   : > { %1120 = vst [vmem:[%s2050_s11 + $0x78] sm:$0xff] %v1771_v46 }
 0x2ad PF: > { %s1133_s18 = scalar_lea.hbm %s2321_s7, %s1254_s13  ;;  %s1134_s1 = sshll.u32 %s2050_s11, 4  ;;  %s1135_s1 = int_to_ptr.vmem [resolvable:$true] %s1134_s1 }
 0x2ae   : > { %s1136_s4 = sshll.u32 %s1133_s18, 4  ;;  %s1122_s30 = scalar_lea.sflag [#allocation12], %s1942_s21  ;;  %s1137_s4 = int_to_ptr.hbm [resolvable:$true] %s1136_s4 }
 0x2af   : > { %s1674_s24 = sshra.s32 %s1137_s4, 4  ;;  %s1680_s23 = scalar_lea.hbm %s2321_s7, 256  ;;  %s1675_s24 = int_to_ptr.hbm [resolvable:$true] %s1674_s24 }
 0x2b0   : > { %s1676_s12 = scalar_lea.hbm %s1675_s24, 128  ;;  %p1681_p1 = scmp.lt.s32.totalorder %s1675_s24, %s2321_s7 }
 0x2b1   : > { %p1677_p4 = scmp.ne.s32.totalorder %s1675_s24, %s1676_s12  ;;  %p1682_p3 = scmp.lt.s32.totalorder %s1680_s23, %s1676_s12 }
 0x2b3   : > { %p1678_p8 = pnand %p1677_p4, %p1919_p6  ;;  %p1683_p7 = por %p1682_p3, %p1681_p1 }
 0x2b5   : > { %p1679_p9 = pneg %p1678_p8 }
 0x2b7   : > { %p1684_p10 = pnand %p1683_p7, %p1679_p9 }
 0x2b9   : > { %1687 = shalt.err (!%p1684_p10)
}
 0x2ba   : > { %s1772_s21 = smov 128   ;;  %s1773_s13 = smov 8  }
 0x2bb   : > { %1465 = dma.vmem_to_hbm [thread:$0]  (%p1919_p6), %s1135_s1, 2048, %s1137_s4, %s1122_s30, %s1772_s21, %s1772_s21, %s1773_s13  }
 0x2bc PF: > { %s2346_s11 = sld [smem:[#allocation20_spill]]  ;;  %p1487_p11 = scmp.ge.s32.totalorder %s1762_s8, 2 }
 0x2be   : > { %p1479_p12 = pnand %p1487_p11, %p1871_p5 }
 0x2c0   : > { %p1480_p13 = pneg %p1479_p12 }
 0x2c2   : > { %s1151_s9 = sand.u32 1, %s2346_s11  }
 0x2c3   : > { %s1152_s15 = scalar_lea.sflag [#allocation12], %s1151_s9 }
 0x2c4   : > { %1729 = dma.done.wait (%p1480_p13), %s1152_s15, 2048  }
 0x2c5   : > { %1731 = vsyncadd (%p1480_p13), %s1152_s15, 4294965248  ;;  %s24_s8 = sadd.s32 1, %s1762_s8   ;;  %s2348_s28 = sld [smem:[#allocation21_spill]] }
 0x2c6   : > { %p21_p0 = scmp.ge.s32.totalorder %s24_s8, 8   ;;  %s2349_s22 = sld [smem:[#allocation23_spill]] }
 0x2c7   : > { %s2350_s30 = sld [smem:[#allocation24_spill]]  ;;  %s2351_s24 = smov %s1738_s25 }
 0x2c8   : > { %s2352_s25 = smov %s1742_s26  ;;  %s2353_s26 = smov %s1926_s14 }
 0x2c9   : > { %s2354_s27 = smov %s1754_s29  ;;  %23 = sbr.rel (!%p21_p0) target bundleno = 11 (0xb), region = 137 }
 0x2cc   : > { %s2355_s29 = smov %s2349_s22 }
 0x2ce   :  { %1158 = vsyncpa [#allocation11], 1 }
 0x2cf   :  { %1160 = vsyncpa [#allocation11 + $0x1], 1 }
 0x2d0   :  { %1161 = vsyncpa [#allocation14], 1 }
 0x2d1   :  { %1162 = vsyncpa [#allocation12], 1 }
 0x2d2   :  { %1164 = vsyncpa [#allocation12 + $0x1], 1 }

</bundles_post_ra>
